<compile_context>
chip_gen: v7x
topology: tpu7x:2x2x1
jax: 0.10.0
libtpu: 0.0.40
codegen_flags: <defaults>
</compile_context>

<pallas_src>
import functools

import jax
import jax.numpy as jnp
from jax.experimental import pallas as pl
from jax.experimental.pallas import tpu as pltpu

# ---------------- synthetic BertConfig (small) ----------------
VOCAB = 100
HIDDEN = 32
N_LAYERS = 2
N_HEADS = 2
HEAD_DIM = HIDDEN // N_HEADS
INTERMEDIATE = 64
MAX_POS = 64
TYPE_VOCAB = 2
INIT_RANGE = 0.02
LN_EPS = 1e-12

_SMALL_ROWS_PER_LAYER = 8   # rows per layer in the packed small-params array
_CLS_BLOCK = 8              # sublane-aligned row block per sequence for pooler/classifier


# ---------------- single fused Pallas kernel ----------------
def _bert_fused_kernel(
    emb_ref, mask_ref, small_ref,
    qkv_w_ref, ao_w_ref, i_w_ref, o_w_ref, pool_w_ref, pred_w_ref,
    logits_ref,
    *, batch, seq, n_heads, head_dim, n_layers,
):
    hidden = n_heads * head_dim
    inter_dim = i_w_ref.shape[-1]
    n_classes = pred_w_ref.shape[-1]
    f32 = jnp.float32
    bf16 = jnp.bfloat16

    def small(row, width):
        # one packed small-parameter vector, shape (1, width), f32
        return small_ref[row:row + 1, 0:width]

    def layer_norm(x, g, b):
        mean = jnp.mean(x, axis=-1, keepdims=True)
        c = x - mean
        var = jnp.mean(c * c, axis=-1, keepdims=True)
        return (c * jax.lax.rsqrt(var + LN_EPS)) * g + b

    def gelu(x):
        # TODO(synk): reference BERT gelu is erf-based; tanh approximation used here.
        return 0.5 * x * (1.0 + jnp.tanh(0.7978845608028654 * (x + 0.044715 * x * x * x)))

    def mm(a, w, bias=None):
        # bf16 operands for the MXU, f32 accumulation; elementwise stays f32
        out = jnp.dot(a.astype(bf16), w, preferred_element_type=f32)
        if bias is not None:
            out = out + bias
        return out

    mask = mask_ref[...]   # (B*S, B*S) additive: block-diag over batch + padding

    # ----- embedding LayerNorm -----
    h = layer_norm(emb_ref[...], small(0, hidden), small(1, hidden))
    # TODO(synk): nn.Dropout layers are inference-time identity here.

    # ----- encoder layers; hidden state stays resident in vregs -----
    for l in range(n_layers):
        base = 2 + l * _SMALL_ROWS_PER_LAYER
        x = h

        # fused QKV projection for all heads (1/sqrt(head_dim) folded into Q weights)
        qkv = mm(x, qkv_w_ref[l], small(base + 0, 3 * hidden))       # (B*S, 3H) f32

        ctx_heads = []
        for hh in range(n_heads):
            q = qkv[:, hh * head_dim:(hh + 1) * head_dim]
            k = qkv[:, hidden + hh * head_dim:hidden + (hh + 1) * head_dim]
            v = qkv[:, 2 * hidden + hh * head_dim:2 * hidden + (hh + 1) * head_dim]
            s = jax.lax.dot_general(
                q.astype(bf16), k.astype(bf16), (((1,), (1,)), ((), ())),
                preferred_element_type=f32) + mask                    # (B*S, B*S)
            s = s - jnp.max(s, axis=-1, keepdims=True)
            p = jnp.exp(s)
            p = p * pl.reciprocal(jnp.sum(p, axis=-1, keepdims=True), approx=True)
            ctx_heads.append(
                jnp.dot(p.astype(bf16), v.astype(bf16),
                        preferred_element_type=f32))                  # (B*S, D)
        ctx = jnp.concatenate(ctx_heads, axis=-1)                     # (B*S, H) f32

        attn = mm(ctx, ao_w_ref[l], small(base + 1, hidden))
        h = layer_norm(attn + x, small(base + 2, hidden), small(base + 3, hidden))

        # feed-forward with GELU, residual and LayerNorm fused as epilogue
        inter = gelu(mm(h, i_w_ref[l], small(base + 4, inter_dim)))
        ffn = mm(inter, o_w_ref[l], small(base + 5, hidden))
        h = layer_norm(ffn + h, small(base + 6, hidden), small(base + 7, hidden))

    # ----- pooler + classifier on sublane-aligned CLS blocks -----
    pbase = 2 + n_layers * _SMALL_ROWS_PER_LAYER
    cls = jnp.concatenate(
        [h[b * seq:b * seq + _CLS_BLOCK, :] for b in range(batch)], axis=0)  # (B*8, H)
    pooled = jnp.tanh(mm(cls, pool_w_ref[...], small(pbase + 0, hidden)))
    logits = mm(pooled, pred_w_ref[...], small(pbase + 1, n_classes))
    logits_ref[...] = logits.astype(logits_ref.dtype)


# ---------------- deterministic parameter init ----------------
class _KeyGen:
    def __init__(self, key):
        self.key = key

    def __call__(self):
        self.key, sub = jax.random.split(self.key)
        return sub


def init_params(key):
    kg = _KeyGen(key)

    def normal(shape):
        return (INIT_RANGE * jax.random.normal(kg(), shape)).astype(jnp.float32)

    def zeros(shape):
        return jnp.zeros(shape, jnp.float32)

    scale = 1.0 / float(HEAD_DIM) ** 0.5

    # fused per-layer weights; fold the attention scale into the Q block so the
    # kernel does a single `scores + mask` with no per-head scale multiply.
    qkv_w = normal((N_LAYERS, HIDDEN, 3 * HIDDEN))
    qkv_w = qkv_w.at[:, :, :HIDDEN].multiply(scale)
    qkv_b = zeros((N_LAYERS, 3 * HIDDEN))   # Q-part scale fold is a no-op on zeros

    ao_w = normal((N_LAYERS, HIDDEN, HIDDEN))
    ao_b = zeros((N_LAYERS, HIDDEN))
    # NOTE: module's init_weights draws LayerNorm gamma/beta from N(0, 0.02).
    attn_ln_g = normal((N_LAYERS, HIDDEN))
    attn_ln_b = normal((N_LAYERS, HIDDEN))
    i_w = normal((N_LAYERS, HIDDEN, INTERMEDIATE))
    i_b = zeros((N_LAYERS, INTERMEDIATE))
    o_w = normal((N_LAYERS, INTERMEDIATE, HIDDEN))
    o_b = zeros((N_LAYERS, HIDDEN))
    out_ln_g = normal((N_LAYERS, HIDDEN))
    out_ln_b = normal((N_LAYERS, HIDDEN))

    emb_ln_g = normal((HIDDEN,))
    emb_ln_b = normal((HIDDEN,))
    pool_w = normal((HIDDEN, HIDDEN))
    pool_b = zeros((HIDDEN,))
    pred_w = normal((HIDDEN, 2))
    pred_b = zeros((2,))

    # pack every small bias / LayerNorm vector into one 128-lane-padded array
    def row(v):
        return jnp.pad(v, (0, 128 - v.shape[0]))

    rows = [row(emb_ln_g), row(emb_ln_b)]
    for l in range(N_LAYERS):
        rows += [row(qkv_b[l]), row(ao_b[l]), row(attn_ln_g[l]), row(attn_ln_b[l]),
                 row(i_b[l]), row(o_b[l]), row(out_ln_g[l]), row(out_ln_b[l])]
    rows += [row(pool_b), row(pred_b)]
    smalls = jnp.stack(rows, axis=0)   # (2 + 8*N_LAYERS + 2, 128) f32

    return {
        "word_emb": normal((VOCAB, HIDDEN)),
        "pos_emb": normal((MAX_POS, HIDDEN)),
        "type_emb": normal((TYPE_VOCAB, HIDDEN)),
        "smalls": smalls,
        "qkv_w": qkv_w, "ao_w": ao_w, "i_w": i_w, "o_w": o_w,
        "pool_w": pool_w, "pred_w": pred_w,
    }


# ---------------- forward pass (matches BERT.forward) ----------------
def bert_forward(params, text1, text2):
    input_ids = jnp.concatenate([text1, text2], axis=-1)                 # (B, S)
    token_type_ids = jnp.concatenate(
        [jnp.zeros_like(text1), jnp.ones_like(text2)], axis=-1)          # (B, S)
    attention_mask = (input_ids != 0)
    B, S = input_ids.shape

    # embedding gathers kept as plain-JAX glue
    pos_ids = jnp.arange(S, dtype=jnp.int32)[None, :]
    emb = (params["word_emb"][input_ids]
           + params["pos_emb"][pos_ids]
           + params["type_emb"][token_type_ids])                         # (B, S, H)
    emb = emb.reshape(B * S, HIDDEN).astype(jnp.float32)

    # combined additive attention mask over flattened (B*S) rows:
    #   off-block (different sequence) -> -1e9, on-block padded key -> -10000
    pad_add = (1.0 - attention_mask.astype(jnp.float32)) * -10000.0      # (B, S)
    pad_flat = pad_add.reshape(B * S)
    blk = jnp.arange(B * S) // S
    same_seq = blk[:, None] == blk[None, :]
    mask = jnp.where(same_seq, pad_flat[None, :], -1e9).astype(jnp.float32)  # (B*S, B*S)

    bf16 = jnp.bfloat16
    kernel = functools.partial(
        _bert_fused_kernel, batch=B, seq=S, n_heads=N_HEADS,
        head_dim=HEAD_DIM, n_layers=N_LAYERS)

    vmem = pl.BlockSpec(memory_space=pltpu.MemorySpace.VMEM)
    # TODO(synk): on v7x (2 TensorCores) a grid=(B,) with dimension_semantics=("parallel",)
    # would use both cores; grid=() kept here for the 1-TC v5e/v6e chips.
    logits = pl.pallas_call(
        kernel,
        out_shape=jax.ShapeDtypeStruct((B * _CLS_BLOCK, 2), jnp.float32),
        in_specs=[vmem] * 9,
        out_specs=vmem,
    )(emb, mask, params["smalls"],
      params["qkv_w"].astype(bf16), params["ao_w"].astype(bf16),
      params["i_w"].astype(bf16), params["o_w"].astype(bf16),
      params["pool_w"].astype(bf16), params["pred_w"].astype(bf16))

    # first row of each sequence's CLS block -> (B, 2) logits
    return logits.reshape(B, _CLS_BLOCK, 2)[:, 0, :]


if __name__ == "__main__":
    key = jax.random.PRNGKey(0)
    pkey, k1, k2 = jax.random.split(key, 3)
    params = init_params(pkey)

    B, S1, S2 = 2, 8, 8
    text1 = jax.random.randint(k1, (B, S1), 1, VOCAB, dtype=jnp.int32)
    text2 = jax.random.randint(k2, (B, S2), 1, VOCAB, dtype=jnp.int32)
    text2 = text2.at[:, -2:].set(0)  # trailing padding exercises attention_mask

    logits = jax.jit(bert_forward)(params, text1, text2)
    logits = jax.block_until_ready(logits)
    assert logits.shape == (B, 2) and logits.dtype == jnp.float32
    assert bool(jnp.all(jnp.isfinite(logits)))
    print("KERNEL_OK")
</pallas_src>

<mosaic_0001>
module attributes {stable_mosaic.version = 11 : i64} {
  func.func @_bert_fused_kernel(%arg0: memref<32x32xf32, #tpu.memory_space<vmem>>, %arg1: memref<32x32xf32, #tpu.memory_space<vmem>>, %arg2: memref<20x128xf32, #tpu.memory_space<vmem>>, %arg3: memref<2x32x96xbf16, #tpu.memory_space<vmem>>, %arg4: memref<2x32x32xbf16, #tpu.memory_space<vmem>>, %arg5: memref<2x32x64xbf16, #tpu.memory_space<vmem>>, %arg6: memref<2x64x32xbf16, #tpu.memory_space<vmem>>, %arg7: memref<32x32xbf16, #tpu.memory_space<vmem>>, %arg8: memref<32x2xbf16, #tpu.memory_space<vmem>>, %arg9: memref<16x2xf32, #tpu.memory_space<vmem>>) attributes {dimension_semantics = [], scalar_prefetch = 0 : i64, scratch_operands = 0 : i64, tpu.core_type = #tpu.core_type<tc>} {
    %c0 = arith.constant 0 : index
    %c0_0 = arith.constant 0 : index
    %0 = vector.load %arg1[%c0, %c0_0] : memref<32x32xf32, #tpu.memory_space<vmem>>, vector<32x32xf32>
    %c0_1 = arith.constant 0 : index
    %c0_2 = arith.constant 0 : index
    %1 = vector.load %arg0[%c0_1, %c0_2] : memref<32x32xf32, #tpu.memory_space<vmem>>, vector<32x32xf32>
    %c0_3 = arith.constant 0 : index
    %c0_4 = arith.constant 0 : index
    %2 = vector.load %arg2[%c0_3, %c0_4] : memref<20x128xf32, #tpu.memory_space<vmem>>, vector<1x32xf32>
    %c1 = arith.constant 1 : index
    %c0_5 = arith.constant 0 : index
    %3 = vector.load %arg2[%c1, %c0_5] : memref<20x128xf32, #tpu.memory_space<vmem>>, vector<1x32xf32>
    %cst = arith.constant dense<0.000000e+00> : vector<32xf32>
    %4 = vector.multi_reduction <add>, %1, %cst [1] : vector<32x32xf32> to vector<32xf32>
    %5 = vector.shape_cast %4 : vector<32xf32> to vector<32x1xf32>
    %cst_6 = arith.constant 3.200000e+01 : f32
    %6 = vector.broadcast %cst_6 : f32 to vector<32x1xf32>
    %7 = arith.divf %5, %6 : vector<32x1xf32>
    %8 = vector.broadcast %7 : vector<32x1xf32> to vector<32x32xf32>
    %9 = arith.subf %1, %8 : vector<32x32xf32>
    %10 = arith.mulf %9, %9 : vector<32x32xf32>
    %cst_7 = arith.constant dense<0.000000e+00> : vector<32xf32>
    %11 = vector.multi_reduction <add>, %10, %cst_7 [1] : vector<32x32xf32> to vector<32xf32>
    %12 = vector.shape_cast %11 : vector<32xf32> to vector<32x1xf32>
    %cst_8 = arith.constant 3.200000e+01 : f32
    %13 = vector.broadcast %cst_8 : f32 to vector<32x1xf32>
    %14 = arith.divf %12, %13 : vector<32x1xf32>
    %cst_9 = arith.constant 9.99999996E-13 : f32
    %15 = vector.broadcast %cst_9 : f32 to vector<32x1xf32>
    %16 = arith.addf %14, %15 : vector<32x1xf32>
    %17 = math.rsqrt %16 : vector<32x1xf32>
    %18 = vector.broadcast %17 : vector<32x1xf32> to vector<32x32xf32>
    %19 = arith.mulf %9, %18 : vector<32x32xf32>
    %20 = vector.broadcast %2 : vector<1x32xf32> to vector<32x32xf32>
    %21 = arith.mulf %19, %20 : vector<32x32xf32>
    %22 = vector.broadcast %3 : vector<1x32xf32> to vector<32x32xf32>
    %23 = arith.addf %21, %22 : vector<32x32xf32>
    %c0_10 = arith.constant 0 : index
    %c0_11 = arith.constant 0 : index
    %c0_12 = arith.constant 0 : index
    %24 = vector.load %arg3[%c0_10, %c0_11, %c0_12] : memref<2x32x96xbf16, #tpu.memory_space<vmem>>, vector<1x32x96xbf16>
    %25 = vector.shape_cast %24 : vector<1x32x96xbf16> to vector<32x96xbf16>
    %c2 = arith.constant 2 : index
    %c0_13 = arith.constant 0 : index
    %26 = vector.load %arg2[%c2, %c0_13] : memref<20x128xf32, #tpu.memory_space<vmem>>, vector<1x96xf32>
    %27 = arith.truncf %23 : vector<32x32xf32> to vector<32x32xbf16>
    %cst_14 = arith.constant dense<0.000000e+00> : vector<32x96xf32>
    %28 = tpu.matmul %27, %25, %cst_14 {dimension_numbers = #tpu.dot_dimension_numbers<[1], [0], [0], [1], [0, 0, 1, 1], [], []>} : vector<32x32xbf16>, vector<32x96xbf16>, vector<32x96xf32> -> vector<32x96xf32>
    %29 = vector.broadcast %26 : vector<1x96xf32> to vector<32x96xf32>
    %30 = arith.addf %28, %29 : vector<32x96xf32>
    %31 = vector.extract_strided_slice %30 {offsets = [0, 0], sizes = [32, 16], strides = [1, 1]} : vector<32x96xf32> to vector<32x16xf32>
    %32 = vector.extract_strided_slice %30 {offsets = [0, 32], sizes = [32, 16], strides = [1, 1]} : vector<32x96xf32> to vector<32x16xf32>
    %33 = vector.extract_strided_slice %30 {offsets = [0, 64], sizes = [32, 16], strides = [1, 1]} : vector<32x96xf32> to vector<32x16xf32>
    %34 = arith.truncf %31 : vector<32x16xf32> to vector<32x16xbf16>
    %35 = arith.truncf %32 : vector<32x16xf32> to vector<32x16xbf16>
    %cst_15 = arith.constant dense<0.000000e+00> : vector<32x32xf32>
    %36 = tpu.matmul %34, %35, %cst_15 {dimension_numbers = #tpu.dot_dimension_numbers<[1], [1], [0], [0], [0, 0, 1, 0], [], []>} : vector<32x16xbf16>, vector<32x16xbf16>, vector<32x32xf32> -> vector<32x32xf32>
    %37 = arith.addf %36, %0 : vector<32x32xf32>
    %cst_16 = arith.constant dense<0xFF800000> : vector<32xf32>
    %38 = vector.multi_reduction <maximumf>, %37, %cst_16 [1] : vector<32x32xf32> to vector<32xf32>
    %39 = vector.shape_cast %38 : vector<32xf32> to vector<32x1xf32>
    %40 = vector.broadcast %39 : vector<32x1xf32> to vector<32x32xf32>
    %41 = arith.subf %37, %40 : vector<32x32xf32>
    %42 = math.exp %41 : vector<32x32xf32>
    %cst_17 = arith.constant dense<0.000000e+00> : vector<32xf32>
    %43 = vector.multi_reduction <add>, %42, %cst_17 [1] : vector<32x32xf32> to vector<32xf32>
    %44 = vector.shape_cast %43 : vector<32xf32> to vector<32x1xf32>
    %45 = tpu.reciprocal %44 {approx = true} : vector<32x1xf32> -> vector<32x1xf32>
    %46 = vector.broadcast %45 : vector<32x1xf32> to vector<32x32xf32>
    %47 = arith.mulf %42, %46 : vector<32x32xf32>
    %48 = arith.truncf %47 : vector<32x32xf32> to vector<32x32xbf16>
    %49 = arith.truncf %33 : vector<32x16xf32> to vector<32x16xbf16>
    %cst_18 = arith.constant dense<0.000000e+00> : vector<32x16xf32>
    %50 = tpu.matmul %48, %49, %cst_18 {dimension_numbers = #tpu.dot_dimension_numbers<[1], [0], [0], [1], [0, 0, 1, 1], [], []>} : vector<32x32xbf16>, vector<32x16xbf16>, vector<32x16xf32> -> vector<32x16xf32>
    %51 = vector.extract_strided_slice %30 {offsets = [0, 16], sizes = [32, 16], strides = [1, 1]} : vector<32x96xf32> to vector<32x16xf32>
    %52 = vector.extract_strided_slice %30 {offsets = [0, 48], sizes = [32, 16], strides = [1, 1]} : vector<32x96xf32> to vector<32x16xf32>
    %53 = vector.extract_strided_slice %30 {offsets = [0, 80], sizes = [32, 16], strides = [1, 1]} : vector<32x96xf32> to vector<32x16xf32>
    %54 = arith.truncf %51 : vector<32x16xf32> to vector<32x16xbf16>
    %55 = arith.truncf %52 : vector<32x16xf32> to vector<32x16xbf16>
    %cst_19 = arith.constant dense<0.000000e+00> : vector<32x32xf32>
    %56 = tpu.matmul %54, %55, %cst_19 {dimension_numbers = #tpu.dot_dimension_numbers<[1], [1], [0], [0], [0, 0, 1, 0], [], []>} : vector<32x16xbf16>, vector<32x16xbf16>, vector<32x32xf32> -> vector<32x32xf32>
    %57 = arith.addf %56, %0 : vector<32x32xf32>
    %cst_20 = arith.constant dense<0xFF800000> : vector<32xf32>
    %58 = vector.multi_reduction <maximumf>, %57, %cst_20 [1] : vector<32x32xf32> to vector<32xf32>
    %59 = vector.shape_cast %58 : vector<32xf32> to vector<32x1xf32>
    %60 = vector.broadcast %59 : vector<32x1xf32> to vector<32x32xf32>
    %61 = arith.subf %57, %60 : vector<32x32xf32>
    %62 = math.exp %61 : vector<32x32xf32>
    %cst_21 = arith.constant dense<0.000000e+00> : vector<32xf32>
    %63 = vector.multi_reduction <add>, %62, %cst_21 [1] : vector<32x32xf32> to vector<32xf32>
    %64 = vector.shape_cast %63 : vector<32xf32> to vector<32x1xf32>
    %65 = tpu.reciprocal %64 {approx = true} : vector<32x1xf32> -> vector<32x1xf32>
    %66 = vector.broadcast %65 : vector<32x1xf32> to vector<32x32xf32>
    %67 = arith.mulf %62, %66 : vector<32x32xf32>
    %68 = arith.truncf %67 : vector<32x32xf32> to vector<32x32xbf16>
    %69 = arith.truncf %53 : vector<32x16xf32> to vector<32x16xbf16>
    %cst_22 = arith.constant dense<0.000000e+00> : vector<32x16xf32>
    %70 = tpu.matmul %68, %69, %cst_22 {dimension_numbers = #tpu.dot_dimension_numbers<[1], [0], [0], [1], [0, 0, 1, 1], [], []>} : vector<32x32xbf16>, vector<32x16xbf16>, vector<32x16xf32> -> vector<32x16xf32>
    %71 = tpu.concatenate %50, %70 in 1 : vector<32x16xf32>, vector<32x16xf32> -> vector<32x32xf32>
    %c0_23 = arith.constant 0 : index
    %c0_24 = arith.constant 0 : index
    %c0_25 = arith.constant 0 : index
    %72 = vector.load %arg4[%c0_23, %c0_24, %c0_25] : memref<2x32x32xbf16, #tpu.memory_space<vmem>>, vector<1x32x32xbf16>
    %73 = vector.shape_cast %72 : vector<1x32x32xbf16> to vector<32x32xbf16>
    %c3 = arith.constant 3 : index
    %c0_26 = arith.constant 0 : index
    %74 = vector.load %arg2[%c3, %c0_26] : memref<20x128xf32, #tpu.memory_space<vmem>>, vector<1x32xf32>
    %75 = arith.truncf %71 : vector<32x32xf32> to vector<32x32xbf16>
    %cst_27 = arith.constant dense<0.000000e+00> : vector<32x32xf32>
    %76 = tpu.matmul %75, %73, %cst_27 {dimension_numbers = #tpu.dot_dimension_numbers<[1], [0], [0], [1], [0, 0, 1, 1], [], []>} : vector<32x32xbf16>, vector<32x32xbf16>, vector<32x32xf32> -> vector<32x32xf32>
    %77 = vector.broadcast %74 : vector<1x32xf32> to vector<32x32xf32>
    %78 = arith.addf %76, %77 : vector<32x32xf32>
    %79 = arith.addf %78, %23 : vector<32x32xf32>
    %c4 = arith.constant 4 : index
    %c0_28 = arith.constant 0 : index
    %80 = vector.load %arg2[%c4, %c0_28] : memref<20x128xf32, #tpu.memory_space<vmem>>, vector<1x32xf32>
    %c5 = arith.constant 5 : index
    %c0_29 = arith.constant 0 : index
    %81 = vector.load %arg2[%c5, %c0_29] : memref<20x128xf32, #tpu.memory_space<vmem>>, vector<1x32xf32>
    %cst_30 = arith.constant dense<0.000000e+00> : vector<32xf32>
    %82 = vector.multi_reduction <add>, %79, %cst_30 [1] : vector<32x32xf32> to vector<32xf32>
    %83 = vector.shape_cast %82 : vector<32xf32> to vector<32x1xf32>
    %cst_31 = arith.constant 3.200000e+01 : f32
    %84 = vector.broadcast %cst_31 : f32 to vector<32x1xf32>
    %85 = arith.divf %83, %84 : vector<32x1xf32>
    %86 = vector.broadcast %85 : vector<32x1xf32> to vector<32x32xf32>
    %87 = arith.subf %79, %86 : vector<32x32xf32>
    %88 = arith.mulf %87, %87 : vector<32x32xf32>
    %cst_32 = arith.constant dense<0.000000e+00> : vector<32xf32>
    %89 = vector.multi_reduction <add>, %88, %cst_32 [1] : vector<32x32xf32> to vector<32xf32>
    %90 = vector.shape_cast %89 : vector<32xf32> to vector<32x1xf32>
    %cst_33 = arith.constant 3.200000e+01 : f32
    %91 = vector.broadcast %cst_33 : f32 to vector<32x1xf32>
    %92 = arith.divf %90, %91 : vector<32x1xf32>
    %cst_34 = arith.constant 9.99999996E-13 : f32
    %93 = vector.broadcast %cst_34 : f32 to vector<32x1xf32>
    %94 = arith.addf %92, %93 : vector<32x1xf32>
    %95 = math.rsqrt %94 : vector<32x1xf32>
    %96 = vector.broadcast %95 : vector<32x1xf32> to vector<32x32xf32>
    %97 = arith.mulf %87, %96 : vector<32x32xf32>
    %98 = vector.broadcast %80 : vector<1x32xf32> to vector<32x32xf32>
    %99 = arith.mulf %97, %98 : vector<32x32xf32>
    %100 = vector.broadcast %81 : vector<1x32xf32> to vector<32x32xf32>
    %101 = arith.addf %99, %100 : vector<32x32xf32>
    %c0_35 = arith.constant 0 : index
    %c0_36 = arith.constant 0 : index
    %c0_37 = arith.constant 0 : index
    %102 = vector.load %arg5[%c0_35, %c0_36, %c0_37] : memref<2x32x64xbf16, #tpu.memory_space<vmem>>, vector<1x32x64xbf16>
    %103 = vector.shape_cast %102 : vector<1x32x64xbf16> to vector<32x64xbf16>
    %c6 = arith.constant 6 : index
    %c0_38 = arith.constant 0 : index
    %104 = vector.load %arg2[%c6, %c0_38] : memref<20x128xf32, #tpu.memory_space<vmem>>, vector<1x64xf32>
    %105 = arith.truncf %101 : vector<32x32xf32> to vector<32x32xbf16>
    %cst_39 = arith.constant dense<0.000000e+00> : vector<32x64xf32>
    %106 = tpu.matmul %105, %103, %cst_39 {dimension_numbers = #tpu.dot_dimension_numbers<[1], [0], [0], [1], [0, 0, 1, 1], [], []>} : vector<32x32xbf16>, vector<32x64xbf16>, vector<32x64xf32> -> vector<32x64xf32>
    %107 = vector.broadcast %104 : vector<1x64xf32> to vector<32x64xf32>
    %108 = arith.addf %106, %107 : vector<32x64xf32>
    %cst_40 = arith.constant 5.000000e-01 : f32
    %109 = vector.broadcast %cst_40 : f32 to vector<32x64xf32>
    %110 = arith.mulf %109, %108 : vector<32x64xf32>
    %cst_41 = arith.constant 4.471500e-02 : f32
    %111 = vector.broadcast %cst_41 : f32 to vector<32x64xf32>
    %112 = arith.mulf %111, %108 : vector<32x64xf32>
    %113 = arith.mulf %112, %108 : vector<32x64xf32>
    %114 = arith.mulf %113, %108 : vector<32x64xf32>
    %115 = arith.addf %108, %114 : vector<32x64xf32>
    %cst_42 = arith.constant 0.797884583 : f32
    %116 = vector.broadcast %cst_42 : f32 to vector<32x64xf32>
    %117 = arith.mulf %116, %115 : vector<32x64xf32>
    %118 = math.tanh %117 : vector<32x64xf32>
    %cst_43 = arith.constant 1.000000e+00 : f32
    %119 = vector.broadcast %cst_43 : f32 to vector<32x64xf32>
    %120 = arith.addf %119, %118 : vector<32x64xf32>
    %121 = arith.mulf %110, %120 : vector<32x64xf32>
    %c0_44 = arith.constant 0 : index
    %c0_45 = arith.constant 0 : index
    %c0_46 = arith.constant 0 : index
    %122 = vector.load %arg6[%c0_44, %c0_45, %c0_46] : memref<2x64x32xbf16, #tpu.memory_space<vmem>>, vector<1x64x32xbf16>
    %123 = vector.shape_cast %122 : vector<1x64x32xbf16> to vector<64x32xbf16>
    %c7 = arith.constant 7 : index
    %c0_47 = arith.constant 0 : index
    %124 = vector.load %arg2[%c7, %c0_47] : memref<20x128xf32, #tpu.memory_space<vmem>>, vector<1x32xf32>
    %125 = arith.truncf %121 : vector<32x64xf32> to vector<32x64xbf16>
    %cst_48 = arith.constant dense<0.000000e+00> : vector<32x32xf32>
    %126 = tpu.matmul %125, %123, %cst_48 {dimension_numbers = #tpu.dot_dimension_numbers<[1], [0], [0], [1], [0, 0, 1, 1], [], []>} : vector<32x64xbf16>, vector<64x32xbf16>, vector<32x32xf32> -> vector<32x32xf32>
    %127 = vector.broadcast %124 : vector<1x32xf32> to vector<32x32xf32>
    %128 = arith.addf %126, %127 : vector<32x32xf32>
    %129 = arith.addf %128, %101 : vector<32x32xf32>
    %c8 = arith.constant 8 : index
    %c0_49 = arith.constant 0 : index
    %130 = vector.load %arg2[%c8, %c0_49] : memref<20x128xf32, #tpu.memory_space<vmem>>, vector<1x32xf32>
    %c9 = arith.constant 9 : index
    %c0_50 = arith.constant 0 : index
    %131 = vector.load %arg2[%c9, %c0_50] : memref<20x128xf32, #tpu.memory_space<vmem>>, vector<1x32xf32>
    %cst_51 = arith.constant dense<0.000000e+00> : vector<32xf32>
    %132 = vector.multi_reduction <add>, %129, %cst_51 [1] : vector<32x32xf32> to vector<32xf32>
    %133 = vector.shape_cast %132 : vector<32xf32> to vector<32x1xf32>
    %cst_52 = arith.constant 3.200000e+01 : f32
    %134 = vector.broadcast %cst_52 : f32 to vector<32x1xf32>
    %135 = arith.divf %133, %134 : vector<32x1xf32>
    %136 = vector.broadcast %135 : vector<32x1xf32> to vector<32x32xf32>
    %137 = arith.subf %129, %136 : vector<32x32xf32>
    %138 = arith.mulf %137, %137 : vector<32x32xf32>
    %cst_53 = arith.constant dense<0.000000e+00> : vector<32xf32>
    %139 = vector.multi_reduction <add>, %138, %cst_53 [1] : vector<32x32xf32> to vector<32xf32>
    %140 = vector.shape_cast %139 : vector<32xf32> to vector<32x1xf32>
    %cst_54 = arith.constant 3.200000e+01 : f32
    %141 = vector.broadcast %cst_54 : f32 to vector<32x1xf32>
    %142 = arith.divf %140, %141 : vector<32x1xf32>
    %cst_55 = arith.constant 9.99999996E-13 : f32
    %143 = vector.broadcast %cst_55 : f32 to vector<32x1xf32>
    %144 = arith.addf %142, %143 : vector<32x1xf32>
    %145 = math.rsqrt %144 : vector<32x1xf32>
    %146 = vector.broadcast %145 : vector<32x1xf32> to vector<32x32xf32>
    %147 = arith.mulf %137, %146 : vector<32x32xf32>
    %148 = vector.broadcast %130 : vector<1x32xf32> to vector<32x32xf32>
    %149 = arith.mulf %147, %148 : vector<32x32xf32>
    %150 = vector.broadcast %131 : vector<1x32xf32> to vector<32x32xf32>
    %151 = arith.addf %149, %150 : vector<32x32xf32>
    %c1_56 = arith.constant 1 : index
    %c0_57 = arith.constant 0 : index
    %c0_58 = arith.constant 0 : index
    %152 = vector.load %arg3[%c1_56, %c0_57, %c0_58] : memref<2x32x96xbf16, #tpu.memory_space<vmem>>, vector<1x32x96xbf16>
    %153 = vector.shape_cast %152 : vector<1x32x96xbf16> to vector<32x96xbf16>
    %c10 = arith.constant 10 : index
    %c0_59 = arith.constant 0 : index
    %154 = vector.load %arg2[%c10, %c0_59] : memref<20x128xf32, #tpu.memory_space<vmem>>, vector<1x96xf32>
    %155 = arith.truncf %151 : vector<32x32xf32> to vector<32x32xbf16>
    %cst_60 = arith.constant dense<0.000000e+00> : vector<32x96xf32>
    %156 = tpu.matmul %155, %153, %cst_60 {dimension_numbers = #tpu.dot_dimension_numbers<[1], [0], [0], [1], [0, 0, 1, 1], [], []>} : vector<32x32xbf16>, vector<32x96xbf16>, vector<32x96xf32> -> vector<32x96xf32>
    %157 = vector.broadcast %154 : vector<1x96xf32> to vector<32x96xf32>
    %158 = arith.addf %156, %157 : vector<32x96xf32>
    %159 = vector.extract_strided_slice %158 {offsets = [0, 0], sizes = [32, 16], strides = [1, 1]} : vector<32x96xf32> to vector<32x16xf32>
    %160 = vector.extract_strided_slice %158 {offsets = [0, 32], sizes = [32, 16], strides = [1, 1]} : vector<32x96xf32> to vector<32x16xf32>
    %161 = vector.extract_strided_slice %158 {offsets = [0, 64], sizes = [32, 16], strides = [1, 1]} : vector<32x96xf32> to vector<32x16xf32>
    %162 = arith.truncf %159 : vector<32x16xf32> to vector<32x16xbf16>
    %163 = arith.truncf %160 : vector<32x16xf32> to vector<32x16xbf16>
    %cst_61 = arith.constant dense<0.000000e+00> : vector<32x32xf32>
    %164 = tpu.matmul %162, %163, %cst_61 {dimension_numbers = #tpu.dot_dimension_numbers<[1], [1], [0], [0], [0, 0, 1, 0], [], []>} : vector<32x16xbf16>, vector<32x16xbf16>, vector<32x32xf32> -> vector<32x32xf32>
    %165 = arith.addf %164, %0 : vector<32x32xf32>
    %cst_62 = arith.constant dense<0xFF800000> : vector<32xf32>
    %166 = vector.multi_reduction <maximumf>, %165, %cst_62 [1] : vector<32x32xf32> to vector<32xf32>
    %167 = vector.shape_cast %166 : vector<32xf32> to vector<32x1xf32>
    %168 = vector.broadcast %167 : vector<32x1xf32> to vector<32x32xf32>
    %169 = arith.subf %165, %168 : vector<32x32xf32>
    %170 = math.exp %169 : vector<32x32xf32>
    %cst_63 = arith.constant dense<0.000000e+00> : vector<32xf32>
    %171 = vector.multi_reduction <add>, %170, %cst_63 [1] : vector<32x32xf32> to vector<32xf32>
    %172 = vector.shape_cast %171 : vector<32xf32> to vector<32x1xf32>
    %173 = tpu.reciprocal %172 {approx = true} : vector<32x1xf32> -> vector<32x1xf32>
    %174 = vector.broadcast %173 : vector<32x1xf32> to vector<32x32xf32>
    %175 = arith.mulf %170, %174 : vector<32x32xf32>
    %176 = arith.truncf %175 : vector<32x32xf32> to vector<32x32xbf16>
    %177 = arith.truncf %161 : vector<32x16xf32> to vector<32x16xbf16>
    %cst_64 = arith.constant dense<0.000000e+00> : vector<32x16xf32>
    %178 = tpu.matmul %176, %177, %cst_64 {dimension_numbers = #tpu.dot_dimension_numbers<[1], [0], [0], [1], [0, 0, 1, 1], [], []>} : vector<32x32xbf16>, vector<32x16xbf16>, vector<32x16xf32> -> vector<32x16xf32>
    %179 = vector.extract_strided_slice %158 {offsets = [0, 16], sizes = [32, 16], strides = [1, 1]} : vector<32x96xf32> to vector<32x16xf32>
    %180 = vector.extract_strided_slice %158 {offsets = [0, 48], sizes = [32, 16], strides = [1, 1]} : vector<32x96xf32> to vector<32x16xf32>
    %181 = vector.extract_strided_slice %158 {offsets = [0, 80], sizes = [32, 16], strides = [1, 1]} : vector<32x96xf32> to vector<32x16xf32>
    %182 = arith.truncf %179 : vector<32x16xf32> to vector<32x16xbf16>
    %183 = arith.truncf %180 : vector<32x16xf32> to vector<32x16xbf16>
    %cst_65 = arith.constant dense<0.000000e+00> : vector<32x32xf32>
    %184 = tpu.matmul %182, %183, %cst_65 {dimension_numbers = #tpu.dot_dimension_numbers<[1], [1], [0], [0], [0, 0, 1, 0], [], []>} : vector<32x16xbf16>, vector<32x16xbf16>, vector<32x32xf32> -> vector<32x32xf32>
    %185 = arith.addf %184, %0 : vector<32x32xf32>
    %cst_66 = arith.constant dense<0xFF800000> : vector<32xf32>
    %186 = vector.multi_reduction <maximumf>, %185, %cst_66 [1] : vector<32x32xf32> to vector<32xf32>
    %187 = vector.shape_cast %186 : vector<32xf32> to vector<32x1xf32>
    %188 = vector.broadcast %187 : vector<32x1xf32> to vector<32x32xf32>
    %189 = arith.subf %185, %188 : vector<32x32xf32>
    %190 = math.exp %189 : vector<32x32xf32>
    %cst_67 = arith.constant dense<0.000000e+00> : vector<32xf32>
    %191 = vector.multi_reduction <add>, %190, %cst_67 [1] : vector<32x32xf32> to vector<32xf32>
    %192 = vector.shape_cast %191 : vector<32xf32> to vector<32x1xf32>
    %193 = tpu.reciprocal %192 {approx = true} : vector<32x1xf32> -> vector<32x1xf32>
    %194 = vector.broadcast %193 : vector<32x1xf32> to vector<32x32xf32>
    %195 = arith.mulf %190, %194 : vector<32x32xf32>
    %196 = arith.truncf %195 : vector<32x32xf32> to vector<32x32xbf16>
    %197 = arith.truncf %181 : vector<32x16xf32> to vector<32x16xbf16>
    %cst_68 = arith.constant dense<0.000000e+00> : vector<32x16xf32>
    %198 = tpu.matmul %196, %197, %cst_68 {dimension_numbers = #tpu.dot_dimension_numbers<[1], [0], [0], [1], [0, 0, 1, 1], [], []>} : vector<32x32xbf16>, vector<32x16xbf16>, vector<32x16xf32> -> vector<32x16xf32>
    %199 = tpu.concatenate %178, %198 in 1 : vector<32x16xf32>, vector<32x16xf32> -> vector<32x32xf32>
    %c1_69 = arith.constant 1 : index
    %c0_70 = arith.constant 0 : index
    %c0_71 = arith.constant 0 : index
    %200 = vector.load %arg4[%c1_69, %c0_70, %c0_71] : memref<2x32x32xbf16, #tpu.memory_space<vmem>>, vector<1x32x32xbf16>
    %201 = vector.shape_cast %200 : vector<1x32x32xbf16> to vector<32x32xbf16>
    %c11 = arith.constant 11 : index
    %c0_72 = arith.constant 0 : index
    %202 = vector.load %arg2[%c11, %c0_72] : memref<20x128xf32, #tpu.memory_space<vmem>>, vector<1x32xf32>
    %203 = arith.truncf %199 : vector<32x32xf32> to vector<32x32xbf16>
    %cst_73 = arith.constant dense<0.000000e+00> : vector<32x32xf32>
    %204 = tpu.matmul %203, %201, %cst_73 {dimension_numbers = #tpu.dot_dimension_numbers<[1], [0], [0], [1], [0, 0, 1, 1], [], []>} : vector<32x32xbf16>, vector<32x32xbf16>, vector<32x32xf32> -> vector<32x32xf32>
    %205 = vector.broadcast %202 : vector<1x32xf32> to vector<32x32xf32>
    %206 = arith.addf %204, %205 : vector<32x32xf32>
    %207 = arith.addf %206, %151 : vector<32x32xf32>
    %c12 = arith.constant 12 : index
    %c0_74 = arith.constant 0 : index
    %208 = vector.load %arg2[%c12, %c0_74] : memref<20x128xf32, #tpu.memory_space<vmem>>, vector<1x32xf32>
    %c13 = arith.constant 13 : index
    %c0_75 = arith.constant 0 : index
    %209 = vector.load %arg2[%c13, %c0_75] : memref<20x128xf32, #tpu.memory_space<vmem>>, vector<1x32xf32>
    %cst_76 = arith.constant dense<0.000000e+00> : vector<32xf32>
    %210 = vector.multi_reduction <add>, %207, %cst_76 [1] : vector<32x32xf32> to vector<32xf32>
    %211 = vector.shape_cast %210 : vector<32xf32> to vector<32x1xf32>
    %cst_77 = arith.constant 3.200000e+01 : f32
    %212 = vector.broadcast %cst_77 : f32 to vector<32x1xf32>
    %213 = arith.divf %211, %212 : vector<32x1xf32>
    %214 = vector.broadcast %213 : vector<32x1xf32> to vector<32x32xf32>
    %215 = arith.subf %207, %214 : vector<32x32xf32>
    %216 = arith.mulf %215, %215 : vector<32x32xf32>
    %cst_78 = arith.constant dense<0.000000e+00> : vector<32xf32>
    %217 = vector.multi_reduction <add>, %216, %cst_78 [1] : vector<32x32xf32> to vector<32xf32>
    %218 = vector.shape_cast %217 : vector<32xf32> to vector<32x1xf32>
    %cst_79 = arith.constant 3.200000e+01 : f32
    %219 = vector.broadcast %cst_79 : f32 to vector<32x1xf32>
    %220 = arith.divf %218, %219 : vector<32x1xf32>
    %cst_80 = arith.constant 9.99999996E-13 : f32
    %221 = vector.broadcast %cst_80 : f32 to vector<32x1xf32>
    %222 = arith.addf %220, %221 : vector<32x1xf32>
    %223 = math.rsqrt %222 : vector<32x1xf32>
    %224 = vector.broadcast %223 : vector<32x1xf32> to vector<32x32xf32>
    %225 = arith.mulf %215, %224 : vector<32x32xf32>
    %226 = vector.broadcast %208 : vector<1x32xf32> to vector<32x32xf32>
    %227 = arith.mulf %225, %226 : vector<32x32xf32>
    %228 = vector.broadcast %209 : vector<1x32xf32> to vector<32x32xf32>
    %229 = arith.addf %227, %228 : vector<32x32xf32>
    %c1_81 = arith.constant 1 : index
    %c0_82 = arith.constant 0 : index
    %c0_83 = arith.constant 0 : index
    %230 = vector.load %arg5[%c1_81, %c0_82, %c0_83] : memref<2x32x64xbf16, #tpu.memory_space<vmem>>, vector<1x32x64xbf16>
    %231 = vector.shape_cast %230 : vector<1x32x64xbf16> to vector<32x64xbf16>
    %c14 = arith.constant 14 : index
    %c0_84 = arith.constant 0 : index
    %232 = vector.load %arg2[%c14, %c0_84] : memref<20x128xf32, #tpu.memory_space<vmem>>, vector<1x64xf32>
    %233 = arith.truncf %229 : vector<32x32xf32> to vector<32x32xbf16>
    %cst_85 = arith.constant dense<0.000000e+00> : vector<32x64xf32>
    %234 = tpu.matmul %233, %231, %cst_85 {dimension_numbers = #tpu.dot_dimension_numbers<[1], [0], [0], [1], [0, 0, 1, 1], [], []>} : vector<32x32xbf16>, vector<32x64xbf16>, vector<32x64xf32> -> vector<32x64xf32>
    %235 = vector.broadcast %232 : vector<1x64xf32> to vector<32x64xf32>
    %236 = arith.addf %234, %235 : vector<32x64xf32>
    %cst_86 = arith.constant 5.000000e-01 : f32
    %237 = vector.broadcast %cst_86 : f32 to vector<32x64xf32>
    %238 = arith.mulf %237, %236 : vector<32x64xf32>
    %cst_87 = arith.constant 4.471500e-02 : f32
    %239 = vector.broadcast %cst_87 : f32 to vector<32x64xf32>
    %240 = arith.mulf %239, %236 : vector<32x64xf32>
    %241 = arith.mulf %240, %236 : vector<32x64xf32>
    %242 = arith.mulf %241, %236 : vector<32x64xf32>
    %243 = arith.addf %236, %242 : vector<32x64xf32>
    %cst_88 = arith.constant 0.797884583 : f32
    %244 = vector.broadcast %cst_88 : f32 to vector<32x64xf32>
    %245 = arith.mulf %244, %243 : vector<32x64xf32>
    %246 = math.tanh %245 : vector<32x64xf32>
    %cst_89 = arith.constant 1.000000e+00 : f32
    %247 = vector.broadcast %cst_89 : f32 to vector<32x64xf32>
    %248 = arith.addf %247, %246 : vector<32x64xf32>
    %249 = arith.mulf %238, %248 : vector<32x64xf32>
    %c1_90 = arith.constant 1 : index
    %c0_91 = arith.constant 0 : index
    %c0_92 = arith.constant 0 : index
    %250 = vector.load %arg6[%c1_90, %c0_91, %c0_92] : memref<2x64x32xbf16, #tpu.memory_space<vmem>>, vector<1x64x32xbf16>
    %251 = vector.shape_cast %250 : vector<1x64x32xbf16> to vector<64x32xbf16>
    %c15 = arith.constant 15 : index
    %c0_93 = arith.constant 0 : index
    %252 = vector.load %arg2[%c15, %c0_93] : memref<20x128xf32, #tpu.memory_space<vmem>>, vector<1x32xf32>
    %253 = arith.truncf %249 : vector<32x64xf32> to vector<32x64xbf16>
    %cst_94 = arith.constant dense<0.000000e+00> : vector<32x32xf32>
    %254 = tpu.matmul %253, %251, %cst_94 {dimension_numbers = #tpu.dot_dimension_numbers<[1], [0], [0], [1], [0, 0, 1, 1], [], []>} : vector<32x64xbf16>, vector<64x32xbf16>, vector<32x32xf32> -> vector<32x32xf32>
    %255 = vector.broadcast %252 : vector<1x32xf32> to vector<32x32xf32>
    %256 = arith.addf %254, %255 : vector<32x32xf32>
    %257 = arith.addf %256, %229 : vector<32x32xf32>
    %c16 = arith.constant 16 : index
    %c0_95 = arith.constant 0 : index
    %258 = vector.load %arg2[%c16, %c0_95] : memref<20x128xf32, #tpu.memory_space<vmem>>, vector<1x32xf32>
    %c17 = arith.constant 17 : index
    %c0_96 = arith.constant 0 : index
    %259 = vector.load %arg2[%c17, %c0_96] : memref<20x128xf32, #tpu.memory_space<vmem>>, vector<1x32xf32>
    %cst_97 = arith.constant dense<0.000000e+00> : vector<32xf32>
    %260 = vector.multi_reduction <add>, %257, %cst_97 [1] : vector<32x32xf32> to vector<32xf32>
    %261 = vector.shape_cast %260 : vector<32xf32> to vector<32x1xf32>
    %cst_98 = arith.constant 3.200000e+01 : f32
    %262 = vector.broadcast %cst_98 : f32 to vector<32x1xf32>
    %263 = arith.divf %261, %262 : vector<32x1xf32>
    %264 = vector.broadcast %263 : vector<32x1xf32> to vector<32x32xf32>
    %265 = arith.subf %257, %264 : vector<32x32xf32>
    %266 = arith.mulf %265, %265 : vector<32x32xf32>
    %cst_99 = arith.constant dense<0.000000e+00> : vector<32xf32>
    %267 = vector.multi_reduction <add>, %266, %cst_99 [1] : vector<32x32xf32> to vector<32xf32>
    %268 = vector.shape_cast %267 : vector<32xf32> to vector<32x1xf32>
    %cst_100 = arith.constant 3.200000e+01 : f32
    %269 = vector.broadcast %cst_100 : f32 to vector<32x1xf32>
    %270 = arith.divf %268, %269 : vector<32x1xf32>
    %cst_101 = arith.constant 9.99999996E-13 : f32
    %271 = vector.broadcast %cst_101 : f32 to vector<32x1xf32>
    %272 = arith.addf %270, %271 : vector<32x1xf32>
    %273 = math.rsqrt %272 : vector<32x1xf32>
    %274 = vector.broadcast %273 : vector<32x1xf32> to vector<32x32xf32>
    %275 = arith.mulf %265, %274 : vector<32x32xf32>
    %276 = vector.broadcast %258 : vector<1x32xf32> to vector<32x32xf32>
    %277 = arith.mulf %275, %276 : vector<32x32xf32>
    %278 = vector.broadcast %259 : vector<1x32xf32> to vector<32x32xf32>
    %279 = arith.addf %277, %278 : vector<32x32xf32>
    %280 = vector.extract_strided_slice %279 {offsets = [0, 0], sizes = [8, 32], strides = [1, 1]} : vector<32x32xf32> to vector<8x32xf32>
    %281 = vector.extract_strided_slice %279 {offsets = [16, 0], sizes = [8, 32], strides = [1, 1]} : vector<32x32xf32> to vector<8x32xf32>
    %282 = tpu.concatenate %280, %281 in 0 : vector<8x32xf32>, vector<8x32xf32> -> vector<16x32xf32>
    %c0_102 = arith.constant 0 : index
    %c0_103 = arith.constant 0 : index
    %283 = vector.load %arg7[%c0_102, %c0_103] : memref<32x32xbf16, #tpu.memory_space<vmem>>, vector<32x32xbf16>
    %c18 = arith.constant 18 : index
    %c0_104 = arith.constant 0 : index
    %284 = vector.load %arg2[%c18, %c0_104] : memref<20x128xf32, #tpu.memory_space<vmem>>, vector<1x32xf32>
    %285 = arith.truncf %282 : vector<16x32xf32> to vector<16x32xbf16>
    %cst_105 = arith.constant dense<0.000000e+00> : vector<16x32xf32>
    %286 = tpu.matmul %285, %283, %cst_105 {dimension_numbers = #tpu.dot_dimension_numbers<[1], [0], [0], [1], [0, 0, 1, 1], [], []>} : vector<16x32xbf16>, vector<32x32xbf16>, vector<16x32xf32> -> vector<16x32xf32>
    %287 = vector.broadcast %284 : vector<1x32xf32> to vector<16x32xf32>
    %288 = arith.addf %286, %287 : vector<16x32xf32>
    %289 = math.tanh %288 : vector<16x32xf32>
    %c0_106 = arith.constant 0 : index
    %c0_107 = arith.constant 0 : index
    %290 = vector.load %arg8[%c0_106, %c0_107] : memref<32x2xbf16, #tpu.memory_space<vmem>>, vector<32x2xbf16>
    %c19 = arith.constant 19 : index
    %c0_108 = arith.constant 0 : index
    %291 = vector.load %arg2[%c19, %c0_108] : memref<20x128xf32, #tpu.memory_space<vmem>>, vector<1x2xf32>
    %292 = arith.truncf %289 : vector<16x32xf32> to vector<16x32xbf16>
    %cst_109 = arith.constant dense<0.000000e+00> : vector<16x2xf32>
    %293 = tpu.matmul %292, %290, %cst_109 {dimension_numbers = #tpu.dot_dimension_numbers<[1], [0], [0], [1], [0, 0, 1, 1], [], []>} : vector<16x32xbf16>, vector<32x2xbf16>, vector<16x2xf32> -> vector<16x2xf32>
    %294 = vector.broadcast %291 : vector<1x2xf32> to vector<16x2xf32>
    %295 = arith.addf %293, %294 : vector<16x2xf32>
    %c0_110 = arith.constant 0 : index
    %c0_111 = arith.constant 0 : index
    %296 = vector.load %arg9[%c0_110, %c0_111] : memref<16x2xf32, #tpu.memory_space<vmem>>, vector<16x2xf32>
    tpu.vector_store %arg9[%c0_110, %c0_111], %295 {strides = array<i32>} : memref<16x2xf32, #tpu.memory_space<vmem>>, vector<16x2xf32>,
    return
  }
}

</mosaic_0001>

<bundles_post_ra>
// kernel: bert_forward.1
= control target key start
LH: loop header
LB: loop body
LE: loop exit
PB: predicated region body
PF: predicated region fallthrough
CT: control target
= control target key end

     0   :  { %vm43_vm0 = vcmask 261120   ;;  %vm199_vm1 = vcmask 130048   ;;  %s2502_s26 = smov 96   ;;  %s2503_s14 = smov 64   ;;  %vm869_vm2 = vcmask 523264   ;;  %vm2509_vm3 = vmmov 0   ;;  %s3018_s0 = inlined_call_operand.vmem [shape: f32[32,32], index: 0, kind: input, shape index: {}]   ;;  %s3019_s3 = inlined_call_operand.vmem [shape: bf16[2,32,96], index: 3, kind: input, shape index: {}]   ;;  %s3020_s2 = inlined_call_operand.vmem [shape: f32[20,128], index: 2, kind: input, shape index: {}]   ;;  %s3021_s1 = inlined_call_operand.vmem [shape: f32[32,32], index: 1, kind: input, shape index: {}]   ;;  %s3022_s4 = inlined_call_operand.vmem [shape: bf16[2,32,32], index: 4, kind: input, shape index: {}]   ;;  %s3023_s5 = inlined_call_operand.vmem [shape: bf16[2,32,64], index: 5, kind: input, shape index: {}]   ;;  %s3024_s6 = inlined_call_operand.vmem [shape: bf16[2,64,32], index: 6, kind: input, shape index: {}]   ;;  %s3025_s7 = inlined_call_operand.vmem [shape: bf16[32,32], index: 7, kind: input, shape index: {}]   ;;  %s3026_s8 = inlined_call_operand.vmem [shape: bf16[32,2], index: 8, kind: input, shape index: {}]   ;;  %s3027_s9 = inlined_call_operand.vmem [shape: f32[16,2], index: 9, kind: output, shape index: {}]  }
   0x1   :  { %v37_v0 = vld [vmem:[%s3018_s0] sm:$0xff]  ;;  %v39_v1 = vld [vmem:[%s3018_s0 + $0x10] sm:$0xff]  ;;  %v38_v2 = vld [vmem:[%s3018_s0 + $0x8] sm:$0xff]  ;;  %s2504_s15 = smov 80   ;;  %s2505_s16 = smov 112   ;;  %vm1987_vm4 = vcmask 15360  }
   0x2   :  { %v44_v3 = vsel %vm43_vm0, %v37_v0, 0.0  ;;  %v50_v4 = vsel %vm43_vm0, %v39_v1, 0.0  ;;  %v40_v5 = vld [vmem:[%s3018_s0 + $0x18] sm:$0xff]  ;;  %v47_v6 = vsel %vm43_vm0, %v38_v2, 0.0  ;;  %v2354_v28 = vld [vmem:[%s3019_s3] sm:$0xff]   ;;  %v2355_v29 = vld [vmem:[%s3019_s3 + $0x8] sm:$0xff]  }
   0x3   :  { %45 = vadd.xlane.f32.xlu0 %v44_v3  ;;  %51 = vadd.xlane.f32.xlu1 %v50_v4  ;;  %v53_v7 = vsel %vm43_vm0, %v40_v5, 0.0  ;;  %v1994_v44 = vld [vmem:[%s3020_s2] ss:$0 sm:$0xff]  ;;  %v1995_v50 = vld [vmem:[%s3020_s2 + $0x1] ss:$0 sm:$0xff]  ;;  %s2506_s0 = smov 48  }
   0x4   :  { %2166 = vmatprep.subr.bf16.mxu0 %v2354_v28  ;;  %v1996_v63 = vld [vmem:[%s3020_s2 + $0x2] ss:$0 sm:$0xff]  ;;  %s2507_s21 = smov 16  }
   0x5   :  { %2167 = vmatpush3.bf16.msra.mxu0 %v2354_v28 }
   0x6   :  { %2168 = vmatprep.subr.bf16.mxu0 %v2355_v29 }
   0x7   :  { %48 = vadd.xlane.f32.xlu0 %v47_v6  ;;  %54 = vadd.xlane.f32.xlu1 %v53_v7 }
   0x9   :  { %2169 = vmatpush3.bf16.msra.mxu0 %v2355_v29 }
  0x90   :  { %v46_v8 = vpop.xlane.xlu0 %45  ;;  %v52_v9 = vpop.xlane.xlu1 %51 }
  0x91   :  { %v57_v10 = vmul.f32 0.03125, %v46_v8  ;;  %v59_v11 = vmul.f32 0.03125, %v52_v9 }
  0x93   :  { %v61_v12 = vsub.f32 %v37_v0, %v57_v10  ;;  %v63_v13 = vsub.f32 %v39_v1, %v59_v11 }
  0x94   :  { %v49_v14 = vpop.xlane.xlu0 %48  ;;  %v55_v15 = vpop.xlane.xlu1 %54 }
  0x95   :  { %v58_v16 = vmul.f32 0.03125, %v49_v14  ;;  %v60_v17 = vmul.f32 0.03125, %v55_v15  ;;  %v65_v18 = vmul.f32 %v61_v12, %v61_v12  ;;  %v67_v19 = vmul.f32 %v63_v13, %v63_v13 }
  0x97   :  { %v62_v20 = vsub.f32 %v38_v2, %v58_v16  ;;  %v64_v21 = vsub.f32 %v40_v5, %v60_v17  ;;  %v69_v22 = vsel %vm43_vm0, %v65_v18, 0.0  ;;  %v75_v23 = vsel %vm43_vm0, %v67_v19, 0.0  ;;  %v2633_v16 = vld [vmem:[%s3021_s1 + $0x18] sm:$0xff]  ;;  %v2638_v17 = vld [vmem:[%s3021_s1 + $0x8] sm:$0xff] }
  0x98   :  { %70 = vadd.xlane.f32.xlu0 %v69_v22 }
  0x99   :  { %v66_v24 = vmul.f32 %v62_v20, %v62_v20  ;;  %v68_v25 = vmul.f32 %v64_v21, %v64_v21 }
  0x9b   :  { %v72_v26 = vsel %vm43_vm0, %v66_v24, 0.0  ;;  %v78_v27 = vsel %vm43_vm0, %v68_v25, 0.0 }
  0x9c   :  { %76 = vadd.xlane.f32.xlu0 %v75_v23  ;;  %73 = vadd.xlane.f32.xlu1 %v72_v26 }
  0xa0   :  { %79 = vadd.xlane.f32.xlu1 %v78_v27 }
 0x125   :  { %v71_v30 = vpop.xlane.xlu0 %70 }
 0x126   :  { %v81_v31 = vmul.f32 0.03125, %v71_v30 }
 0x128   :  { %v85_v32 = vadd.f32 1e-12, %v81_v31 }
 0x129   :  { %v74_v33 = vpop.xlane.xlu1 %73  ;;  %v77_v34 = vpop.xlane.xlu0 %76 }
 0x12a   :  { %2378 = vrsqrt.f32 %v85_v32  ;;  %v82_v35 = vmul.f32 0.03125, %v74_v33  ;;  %v83_v36 = vmul.f32 0.03125, %v77_v34 }
 0x12c   :  { %v86_v37 = vadd.f32 1e-12, %v82_v35  ;;  %v87_v38 = vadd.f32 1e-12, %v83_v36 }
 0x12d   :  { %v80_v39 = vpop.xlane.xlu1 %79 }
 0x12e   :  { %2380 = vrsqrt.f32 %v86_v37  ;;  %v84_v40 = vmul.f32 0.03125, %v80_v39 }
 0x12f   :  { %2382 = vrsqrt.f32 %v87_v38 }
 0x130   :  { %v88_v41 = vadd.f32 1e-12, %v84_v40 }
 0x132   :  { %2384 = vrsqrt.f32 %v88_v41 }
 0x134   :  { %v2379_v42 = vpop.eup %2378 }
 0x135   :  { %v93_v43 = vmul.f32 %v2379_v42, %v61_v12 }
 0x137   :  { %v101_v48 = vmul.f32 %v1994_v44, %v93_v43 }
 0x138   :  { %v2381_v45 = vpop.eup %2380 }
 0x139   :  { %v2383_v46 = vpop.eup %2382  ;;  %v94_v47 = vmul.f32 %v2381_v45, %v62_v20  ;;  %v2592_v54 = vadd.f32 %v1995_v50, %v101_v48  ;;  %v2644_v20 = vld [vmem:[%s3021_s1 + $0x10] sm:$0xff] }
 0x13a   :  { %v95_v49 = vmul.f32 %v2383_v46, %v63_v13  ;;  %v2628_v13 = vld [vmem:[%s3021_s1] sm:$0xff] }
 0x13b   :  { %v102_v51 = vmul.f32 %v1994_v44, %v94_v47 }
 0x13c   :  { %v2385_v52 = vpop.eup %2384  ;;  %v103_v56 = vmul.f32 %v1994_v44, %v95_v49 }
 0x13d   :  { %v96_v53 = vmul.f32 %v2385_v52, %v64_v21  ;;  %v2594_v55 = vadd.f32 %v1995_v50, %v102_v51 }
 0x13e   :  { %v2599_v59 = vadd.f32 %v1995_v50, %v103_v56 }
 0x13f   :  { %v118_v57 = vpack.c.bf16 %v2594_v55, %v2592_v54  ;;  %v104_v58 = vmul.f32 %v1994_v44, %v96_v53 }
 0x141   :  { %2170 = vmatprep.mubr.msk.bf16.mxu0 %vm43_vm0, %v118_v57  ;;  %v2601_v60 = vadd.f32 %v1995_v50, %v104_v58 }
 0x143   :  { %v119_v61 = vpack.c.bf16 %v2601_v60, %v2599_v59 }
 0x145   :  { %2171 = vmatmul.mubr.msk.bf16.vlgmr.msra.gmra.mrb[0].mxu0 %vm43_vm0, %v119_v61 }
 0x218   :  { %v2172_v62 = vpop.f32.mrb[0].mxu0 }
 0x219   :  { %v176_v0 = vpop.f32.mrb[1].mxu0  ;;  %v185_v2 = vadd.f32 %v2172_v62, %v1996_v63 }
 0x21a   :  { %v2173_v1 = vpop.f32.mrb[2].mxu0  ;;  %v177_v5 = vadd.f32 %v1996_v63, %v176_v0 }
 0x21b   :  { %v188_v3 = vadd.f32 %v2173_v1, %v1996_v63  ;;  %v179_v4 = vpop.f32.mrb[3].mxu0 }
 0x21c   :  { %v180_v6 = vadd.f32 %v1996_v63, %v179_v4 }
 0x21d   :  { %v2609_v7 = vpack.c.bf16 %v188_v3, %v185_v2 }
 0x21e   :  { %v2611_v8 = vpack.c.bf16 %v180_v6, %v177_v5 }
 0x21f   :  { %197 = vrot.lane.b32.xlu1 %v2609_v7, %s2502_s26 }
 0x220   :  { %195 = vrot.lane.b32.xlu0 %v2611_v8, %s2502_s26  ;;  %2178 = vmatprep.mubr.msk.bf16.mxu1 %vm199_vm1, %v2611_v8 }
 0x291   :  { %v198_v11 = vpop.permute.xlu1 %197 }
 0x292   :  { %v196_v9 = vpop.permute.xlu0 %195  ;;  %v210_v12 = vsel %vm199_vm1, %v198_v11, 0 }
 0x293   :  { %2318 = vmatprep.subr.msk.bf16.mxu1 %vm199_vm1, %v196_v9  ;;  %v207_v10 = vsel %vm199_vm1, %v196_v9, 0 }
 0x294   :  { %2175 = vmatpush3.bf16.xpose.msra.mxu1 %v207_v10 }
 0x295   :  { %2319 = vmatprep.subr.msk.bf16.mxu1 %vm199_vm1, %v198_v11 }
 0x29c   :  { %2177 = vmatpush3.bf16.xpose.msra.mxu1 %v210_v12 }
 0x2a3   :  { %2179 = vmatmul.mubr.msk.bf16.vlgmr.msra.gmra.mrb[0].mxu1 %vm199_vm1, %v2609_v7 }
 0x376   :  { %v2180_v14 = vpop.f32.mrb[0].mxu1 }
 0x377   :  { %v246_v15 = vpop.f32.mrb[1].mxu1  ;;  %v255_v25 = vadd.f32 %v2180_v14, %v2644_v20 }
 0x378   :  { %v247_v18 = vadd.f32 %v246_v15, %v2628_v13  ;;  %v2181_v19 = vpop.f32.mrb[2].mxu1 }
 0x379   :  { %v249_v21 = vpop.f32.mrb[3].mxu1  ;;  %v258_v22 = vadd.f32 %v2181_v19, %v2633_v16  ;;  %v267_v28 = vsel %vm43_vm0, %v255_v25, -inf }
 0x37a   :  { %v250_v23 = vadd.f32 %v249_v21, %v2638_v17  ;;  %v261_v24 = vsel %vm43_vm0, %v247_v18, -inf }
 0x37b   :  { %262 = vmax.xlane.f32.xlu1 %v261_v24  ;;  %v270_v27 = vsel %vm43_vm0, %v258_v22, -inf }
 0x37c   :  { %v264_v26 = vsel %vm43_vm0, %v250_v23, -inf }
 0x37d   :  { %265 = vmax.xlane.f32.xlu0 %v264_v26 }
 0x37f   :  { %271 = vmax.xlane.f32.xlu1 %v270_v27 }
 0x381   :  { %268 = vmax.xlane.f32.xlu0 %v267_v28 }
 0x390   :  { %309 = vrot.lane.b32.xlu1 %v2609_v7, %s2503_s14 }
 0x408   :  { %v263_v29 = vpop.xlane.xlu1 %262 }
 0x409   :  { %v273_v33 = vsub.f32 %v247_v18, %v263_v29 }
 0x40a   :  { %v266_v30 = vpop.xlane.xlu0 %265 }
 0x40b   :  { %v274_v31 = vsub.f32 %v250_v23, %v266_v30  ;;  %v277_v39 = vmul.f32 1.442695, %v273_v33 }
 0x40c   :  { %v272_v32 = vpop.xlane.xlu1 %271 }
 0x40d   :  { %v276_v34 = vsub.f32 %v258_v22, %v272_v32  ;;  %v279_v35 = vmul.f32 1.442695, %v274_v31 }
 0x40e   :  { %v269_v36 = vpop.xlane.xlu0 %268 }
 0x40f   :  { %v283_v37 = vmul.f32 1.442695, %v276_v34  ;;  %v275_v38 = vsub.f32 %v255_v25, %v269_v36 }
 0x410   :  { %v310_v49 = vpop.permute.xlu1 %309 }
 0x411   :  { %2386 = vpow2.f32 %v283_v37  ;;  %v281_v40 = vmul.f32 1.442695, %v275_v38 }
 0x412   :  { %2388 = vpow2.f32 %v279_v35 }
 0x413   :  { %2390 = vpow2.f32 %v281_v40 }
 0x414   :  { %2392 = vpow2.f32 %v277_v39 }
 0x41b   :  { %v2387_v41 = vpop.eup %2386 }
 0x41c   :  { %v2389_v42 = vpop.eup %2388  ;;  %v294_v43 = vsel %vm43_vm0, %v2387_v41, 0.0 }
 0x41d   :  { %v2391_v44 = vpop.eup %2390  ;;  %295 = vadd.xlane.f32.xlu1 %v294_v43  ;;  %v288_v47 = vsel %vm43_vm0, %v2389_v42, 0.0 }
 0x41e   :  { %v291_v45 = vsel %vm43_vm0, %v2391_v44, 0.0  ;;  %v2393_v46 = vpop.eup %2392 }
 0x41f   :  { %292 = vadd.xlane.f32.xlu0 %v291_v45  ;;  %v285_v48 = vsel %vm43_vm0, %v2393_v46, 0.0 }
 0x421   :  { %289 = vadd.xlane.f32.xlu1 %v288_v47 }
 0x423   :  { %286 = vadd.xlane.f32.xlu0 %v285_v48 }
 0x432   :  { %372 = vrot.lane.b32.xlu1 %v2611_v8, %s2504_s15 }
 0x436   :  { %374 = vrot.lane.b32.xlu1 %v2609_v7, %s2504_s15 }
 0x439   :  { %307 = vrot.lane.b32.xlu0 %v2611_v8, %s2503_s14 }
 0x43a   :  { %370 = vrot.lane.b32.xlu1 %v2609_v7, %s2505_s16 }
 0x43d   :  { %368 = vrot.lane.b32.xlu0 %v2611_v8, %s2505_s16 }
 0x4aa   :  { %v296_v50 = vpop.xlane.xlu1 %295 }
 0x4ac   :  { %v293_v51 = vpop.xlane.xlu0 %292 }
 0x4ad   :  { %2394 = vrcp.f32 %v293_v51 }
 0x4ae   :  { %v290_v52 = vpop.xlane.xlu1 %289 }
 0x4af   :  { %2396 = vrcp.f32 %v290_v52 }
 0x4b0   :  { %2398 = vrcp.f32 %v296_v50  ;;  %v287_v53 = vpop.xlane.xlu0 %286 }
 0x4b1   :  { %2400 = vrcp.f32 %v287_v53 }
 0x4b2   :  { %v373_v62 = vpop.permute.xlu1 %372 }
 0x4b3   :  { %v383_v9 = vsel %vm199_vm1, %v373_v62, 0 }
 0x4b4   :  { %v308_v56 = vpop.permute.xlu0 %307 }
 0x4b5   :  { %2182 = vmatprep.subr.bf16.mxu0 %v308_v56 }
 0x4b6   :  { %2183 = vmatpush3.bf16.msra.mxu0 %v308_v56  ;;  %v375_v10 = vpop.permute.xlu1 %374 }
 0x4b7   :  { %2184 = vmatprep.subr.bf16.mxu0 %v310_v49  ;;  %v2395_v57 = vpop.eup %2394  ;;  %v386_v11 = vsel %vm199_vm1, %v375_v10, 0 }
 0x4b8   :  { %v303_v0 = vmul.f32 %v2395_v57, %v2391_v44  ;;  %v369_v6 = vpop.permute.xlu0 %368 }
 0x4b9   :  { %v2397_v58 = vpop.eup %2396 }
 0x4ba   :  { %v2399_v61 = vpop.eup %2398  ;;  %2185 = vmatpush3.bf16.msra.mxu0 %v310_v49  ;;  %v302_v2 = vmul.f32 %v2397_v58, %v2389_v42  ;;  %v371_v12 = vpop.permute.xlu1 %370 }
 0x4bb   :  { %v2401_v63 = vpop.eup %2400  ;;  %2320 = vmatprep.subr.msk.bf16.mxu0 %vm199_vm1, %v373_v62  ;;  %v304_v3 = vmul.f32 %v2399_v61, %v2387_v41 }
 0x4bc   :  { %v301_v1 = vmul.f32 %v2401_v63, %v2393_v46 }
 0x4bd   :  { %v306_v5 = vpack.c.bf16 %v304_v3, %v303_v0 }
 0x4be   :  { %v305_v4 = vpack.c.bf16 %v302_v2, %v301_v1 }
 0x4c0   :  { %2186 = vmatprep.mubr.msk.bf16.mxu0 %vm43_vm0, %v305_v4 }
 0x4c1   :  { %2187 = vmatmul.mubr.msk.bf16.vlgmr.msra.gmra.mrb[4].mxu0 %vm43_vm0, %v306_v5 }
 0x4c2   :  { %2194 = vmatprep.mubr.msk.bf16.mxu0 %vm199_vm1, %v369_v6 }
 0x4c3   :  { %2191 = vmatpush3.bf16.xpose.msra.mxu0 %v383_v9  ;;  %v2356_v9 = vld [vmem:[%s3022_s4] sm:$0xff]  }
 0x4c4   :  { %2321 = vmatprep.subr.msk.bf16.mxu0 %vm199_vm1, %v375_v10  ;;  %v2357_v10 = vld [vmem:[%s3022_s4 + $0x8] sm:$0xff]  }
 0x4cb   :  { %2193 = vmatpush3.bf16.xpose.msra.mxu0 %v386_v11 }
 0x4d2   :  { %2195 = vmatmul.mubr.msk.bf16.vlgmr.msra.gmra.mrb[8].mxu0 %vm199_vm1, %v371_v12 }
 0x594   :  { %v2677_v14 = vpop.f32.mrb[4].mxu0 }
 0x595   :  { %v2679_v15 = vpop.f32.mrb[5].mxu0 }
 0x596   :  { %v2681_v18 = vpop.f32.mrb[6].mxu0 }
 0x597   :  { %v2683_v19 = vpop.f32.mrb[7].mxu0 }
 0x5a5   :  { %v2196_v21 = vpop.f32.mrb[8].mxu0 }
 0x5a6   :  { %v422_v22 = vpop.f32.mrb[9].mxu0  ;;  %v431_v26 = vadd.f32 %v2196_v21, %v2644_v20 }
 0x5a7   :  { %v423_v23 = vadd.f32 %v422_v22, %v2628_v13  ;;  %v2197_v24 = vpop.f32.mrb[10].mxu0 }
 0x5a8   :  { %v425_v25 = vpop.f32.mrb[11].mxu0  ;;  %v434_v30 = vadd.f32 %v2197_v24, %v2633_v16  ;;  %v443_v31 = vsel %vm43_vm0, %v431_v26, -inf }
 0x5a9   :  { %v426_v27 = vadd.f32 %v425_v25, %v2638_v17  ;;  %v437_v28 = vsel %vm43_vm0, %v423_v23, -inf }
 0x5aa   :  { %438 = vmax.xlane.f32.xlu0 %v437_v28  ;;  %v446_v32 = vsel %vm43_vm0, %v434_v30, -inf }
 0x5ab   :  { %v440_v29 = vsel %vm43_vm0, %v426_v27, -inf }
 0x5ac   :  { %441 = vmax.xlane.f32.xlu1 %v440_v29 }
 0x5ae   :  { %444 = vmax.xlane.f32.xlu0 %v443_v31 }
 0x5b2   :  { %447 = vmax.xlane.f32.xlu0 %v446_v32 }
 0x637   :  { %v439_v33 = vpop.xlane.xlu0 %438 }
 0x638   :  { %v449_v34 = vsub.f32 %v423_v23, %v439_v33 }
 0x639   :  { %v442_v35 = vpop.xlane.xlu1 %441 }
 0x63a   :  { %v453_v38 = vmul.f32 1.442695, %v449_v34  ;;  %v450_v39 = vsub.f32 %v426_v27, %v442_v35 }
 0x63b   :  { %v445_v36 = vpop.xlane.xlu0 %444 }
 0x63c   :  { %v451_v37 = vsub.f32 %v431_v26, %v445_v36  ;;  %v455_v43 = vmul.f32 1.442695, %v450_v39 }
 0x63e   :  { %v457_v40 = vmul.f32 1.442695, %v451_v37 }
 0x63f   :  { %v448_v41 = vpop.xlane.xlu0 %447 }
 0x640   :  { %2402 = vpow2.f32 %v457_v40  ;;  %v452_v42 = vsub.f32 %v434_v30, %v448_v41 }
 0x641   :  { %2404 = vpow2.f32 %v453_v38 }
 0x642   :  { %v459_v44 = vmul.f32 1.442695, %v452_v42 }
 0x644   :  { %2406 = vpow2.f32 %v459_v44 }
 0x645   :  { %2408 = vpow2.f32 %v455_v43 }
 0x64a   :  { %v2403_v45 = vpop.eup %2402 }
 0x64b   :  { %v467_v46 = vsel %vm43_vm0, %v2403_v45, 0.0  ;;  %v2405_v47 = vpop.eup %2404 }
 0x64c   :  { %468 = vadd.xlane.f32.xlu0 %v467_v46  ;;  %v461_v49 = vsel %vm43_vm0, %v2405_v47, 0.0 }
 0x64e   :  { %v2407_v48 = vpop.eup %2406 }
 0x64f   :  { %v470_v50 = vsel %vm43_vm0, %v2407_v48, 0.0  ;;  %v2409_v51 = vpop.eup %2408 }
 0x650   :  { %462 = vadd.xlane.f32.xlu0 %v461_v49  ;;  %471 = vadd.xlane.f32.xlu1 %v470_v50  ;;  %v464_v52 = vsel %vm43_vm0, %v2409_v51, 0.0 }
 0x654   :  { %465 = vadd.xlane.f32.xlu1 %v464_v52 }
 0x665   :  { %485 = vrot.lane.b32.xlu1 %v2609_v7, %s2506_s0 }
 0x666   :  { %483 = vrot.lane.b32.xlu0 %v2611_v8, %s2506_s0 }
 0x6d9   :  { %v469_v53 = vpop.xlane.xlu0 %468 }
 0x6dd   :  { %v472_v56 = vpop.xlane.xlu1 %471  ;;  %v463_v57 = vpop.xlane.xlu0 %462 }
 0x6de   :  { %2410 = vrcp.f32 %v472_v56 }
 0x6df   :  { %2412 = vrcp.f32 %v463_v57 }
 0x6e0   :  { %2414 = vrcp.f32 %v469_v53 }
 0x6e1   :  { %v466_v58 = vpop.xlane.xlu1 %465  ;;  %v484_v61 = vpop.permute.xlu0 %483 }
 0x6e2   :  { %2416 = vrcp.f32 %v466_v58  ;;  %2198 = vmatprep.subr.bf16.mxu1 %v484_v61 }
 0x6e3   :  { %2199 = vmatpush3.bf16.msra.mxu1 %v484_v61 }
 0x6e5   :  { %v486_v62 = vpop.permute.xlu1 %485 }
 0x6e6   :  { %2200 = vmatprep.subr.bf16.mxu1 %v486_v62 }
 0x6e7   :  { %2201 = vmatpush3.bf16.msra.mxu1 %v486_v62 }
 0x6e8   :  { %v2411_v63 = vpop.eup %2410  ;;  %2206 = vmatprep.subr.bf16.mxu1 %v2356_v9 }
 0x6e9   :  { %v2413_v0 = vpop.eup %2412  ;;  %v480_v2 = vmul.f32 %v2411_v63, %v2407_v48 }
 0x6ea   :  { %v2415_v7 = vpop.eup %2414  ;;  %v477_v8 = vmul.f32 %v2413_v0, %v2405_v47 }
 0x6eb   :  { %v479_v4 = vmul.f32 %v2415_v7, %v2403_v45 }
 0x6ec   :  { %v2417_v1 = vpop.eup %2416 }
 0x6ed   :  { %v478_v3 = vmul.f32 %v2417_v1, %v2409_v51  ;;  %v482_v6 = vpack.c.bf16 %v480_v2, %v479_v4  ;;  %v2358_v4 = vld [vmem:[%s3023_s5] sm:$0xff]  }
 0x6ee   :  { %2214 = vmatprep.subr.bf16.mxu0 %v2358_v4 }
 0x6ef   :  { %v481_v5 = vpack.c.bf16 %v478_v3, %v477_v8  ;;  %2215 = vmatpush3.bf16.msra.mxu0 %v2358_v4 }
 0x6f1   :  { %2202 = vmatprep.mubr.msk.bf16.mxu1 %vm43_vm0, %v481_v5  ;;  %v2359_v5 = vld [vmem:[%s3023_s5 + $0x8] sm:$0xff]  }
 0x6f2   :  { %2203 = vmatmul.mubr.msk.bf16.vlgmr.msra.gmra.mrb[4].mxu1 %vm43_vm0, %v482_v6  ;;  %2216 = vmatprep.subr.bf16.mxu0 %v2359_v5 }
 0x6f3   :  { %2207 = vmatpush3.bf16.msra.mxu1 %v2356_v9  ;;  %2217 = vmatpush3.bf16.msra.mxu0 %v2359_v5 }
 0x6f4   :  { %2208 = vmatprep.subr.bf16.mxu1 %v2357_v10 }
 0x6f7   :  { %2209 = vmatpush3.bf16.msra.mxu1 %v2357_v10 }
 0x7c5   :  { %v2204_v11 = vpop.f32.mrb[4].mxu1 }
 0x7c6   :  { %v529_v12 = vpop.f32.mrb[5].mxu1 }
 0x7c7   :  { %v2205_v21 = vpop.f32.mrb[6].mxu1 }
 0x7c8   :  { %v2339_v22 = vpack.i.bf16 %v2205_v21, %v2204_v11  ;;  %v532_v23 = vpop.f32.mrb[7].mxu1 }
 0x7c9   :  { %v2334_v24 = vpack.i.bf16 %v532_v23, %v529_v12 }
 0x7cb   :  { %2335 = vrot.lane.b32.xlu1 %v2334_v24, %s2507_s21 }
 0x7cf   :  { %2340 = vrot.lane.b32.xlu1 %v2339_v22, %s2507_s21 }
 0x83d   :  { %v2336_v25 = vpop.permute.xlu1 %2335 }
 0x83e   :  { %v2338_v26 = vunpack.i.h.bf16 %v2336_v25  ;;  %v2337_v27 = vunpack.i.l.bf16 %v2336_v25 }
 0x840   :  { %v561_v28 = vsel %vm199_vm1, %v2683_v19, %v2338_v26  ;;  %v560_v29 = vsel %vm199_vm1, %v2679_v15, %v2337_v27  ;;  %v2009_v19 = vld [vmem:[%s3020_s2 + $0x3] ss:$0 sm:$0xff] }
 0x841   :  { %v569_v30 = vpack.c.bf16 %v561_v28, %v560_v29  ;;  %v2341_v31 = vpop.permute.xlu1 %2340  ;;  %v2014_v29 = vld [vmem:[%s3020_s2 + $0x4] ss:$0 sm:$0xff] }
 0x842   :  { %v2343_v32 = vunpack.i.h.bf16 %v2341_v31  ;;  %v2342_v33 = vunpack.i.l.bf16 %v2341_v31 }
 0x843   :  { %2210 = vmatprep.mubr.msk.bf16.mxu1 %vm43_vm0, %v569_v30 }
 0x844   :  { %v563_v34 = vsel %vm199_vm1, %v2681_v18, %v2343_v32  ;;  %v562_v35 = vsel %vm199_vm1, %v2677_v14, %v2342_v33 }
 0x845   :  { %v570_v36 = vpack.c.bf16 %v563_v34, %v562_v35  ;;  %v2015_v35 = vld [vmem:[%s3020_s2 + $0x5] ss:$0 sm:$0xff] }
 0x847   :  { %2211 = vmatmul.mubr.msk.bf16.vlgmr.msra.gmra.mrb[8].mxu1 %vm43_vm0, %v570_v36 }
 0x91a   :  { %v2212_v15 = vpop.f32.mrb[8].mxu1 }
 0x91b   :  { %v627_v37 = vpop.f32.mrb[9].mxu1  ;;  %v636_v38 = vadd.f32 %v2212_v15, %v2009_v19 }
 0x91c   :  { %v628_v39 = vadd.f32 %v2009_v19, %v627_v37  ;;  %v2213_v40 = vpop.f32.mrb[10].mxu1 }
 0x91d   :  { %v630_v41 = vpop.f32.mrb[11].mxu1  ;;  %v639_v18 = vadd.f32 %v2213_v40, %v2009_v19  ;;  %v644_v45 = vadd.f32 %v636_v38, %v2599_v59 }
 0x91e   :  { %v631_v42 = vadd.f32 %v2009_v19, %v630_v41  ;;  %v642_v43 = vadd.f32 %v628_v39, %v2592_v54 }
 0x91f   :  { %v654_v47 = vsel %vm43_vm0, %v644_v45, 0.0  ;;  %v645_v48 = vadd.f32 %v639_v18, %v2601_v60 }
 0x920   :  { %v648_v44 = vsel %vm43_vm0, %v642_v43, 0.0  ;;  %v643_v14 = vadd.f32 %v631_v42, %v2594_v55 }
 0x921   :  { %649 = vadd.xlane.f32.xlu0 %v648_v44  ;;  %v657_v49 = vsel %vm43_vm0, %v645_v48, 0.0 }
 0x922   :  { %v651_v46 = vsel %vm43_vm0, %v643_v14, 0.0 }
 0x923   :  { %652 = vadd.xlane.f32.xlu1 %v651_v46  ;;  %v2362_v46 = vld [vmem:[%s3024_s6 + $0x10] sm:$0xff]  }
 0x925   :  { %655 = vadd.xlane.f32.xlu0 %v654_v47  ;;  %v2363_v47 = vld [vmem:[%s3024_s6 + $0x18] sm:$0xff]  }
 0x929   :  { %658 = vadd.xlane.f32.xlu0 %v657_v49 }
 0x9ae   :  { %v650_v54 = vpop.xlane.xlu0 %649 }
 0x9af   :  { %v660_v50 = vmul.f32 0.03125, %v650_v54 }
 0x9b0   :  { %v653_v51 = vpop.xlane.xlu1 %652 }
 0x9b1   :  { %v664_v52 = vsub.f32 %v642_v43, %v660_v50  ;;  %v661_v53 = vmul.f32 0.03125, %v653_v51 }
 0x9b2   :  { %v656_v55 = vpop.xlane.xlu0 %655 }
 0x9b3   :  { %v665_v56 = vsub.f32 %v643_v14, %v661_v53  ;;  %v662_v59 = vmul.f32 0.03125, %v656_v55  ;;  %v668_v57 = vmul.f32 %v664_v52, %v664_v52  ;;  %v2360_v14 = vld [vmem:[%s3024_s6] sm:$0xff]  }
 0x9b4   :  { %2222 = vmatprep.subr.bf16.mxu1 %v2360_v14 }
 0x9b5   :  { %v666_v58 = vsub.f32 %v644_v45, %v662_v59  ;;  %v672_v61 = vsel %vm43_vm0, %v668_v57, 0.0  ;;  %v669_v62 = vmul.f32 %v665_v56, %v665_v56  ;;  %v2361_v45 = vld [vmem:[%s3024_s6 + $0x8] sm:$0xff]   ;;  %2223 = vmatpush3.bf16.msra.mxu1 %v2360_v14 }
 0x9b6   :  { %673 = vadd.xlane.f32.xlu0 %v672_v61  ;;  %v659_v63 = vpop.xlane.xlu0 %658  ;;  %2224 = vmatprep.subr.bf16.mxu1 %v2361_v45 }
 0x9b7   :  { %v663_v60 = vmul.f32 0.03125, %v659_v63  ;;  %v675_v0 = vsel %vm43_vm0, %v669_v62, 0.0  ;;  %v670_v7 = vmul.f32 %v666_v58, %v666_v58 }
 0x9b8   :  { %676 = vadd.xlane.f32.xlu1 %v675_v0 }
 0x9b9   :  { %v667_v1 = vsub.f32 %v645_v48, %v663_v60  ;;  %v678_v2 = vsel %vm43_vm0, %v670_v7, 0.0  ;;  %2225 = vmatpush3.bf16.msra.mxu1 %v2361_v45  ;;  %v2016_v48 = vld [vmem:[%s3020_s2 + $0x6] ss:$0 sm:$0xff] }
 0x9ba   :  { %679 = vadd.xlane.f32.xlu0 %v678_v2  ;;  %2226 = vmatprep.subr.bf16.mxu1 %v2362_v46 }
 0x9bb   :  { %v671_v8 = vmul.f32 %v667_v1, %v667_v1 }
 0x9bd   :  { %v681_v3 = vsel %vm43_vm0, %v671_v8, 0.0  ;;  %2227 = vmatpush3.bf16.msra.mxu1 %v2362_v46 }
 0x9be   :  { %682 = vadd.xlane.f32.xlu1 %v681_v3  ;;  %2228 = vmatprep.subr.bf16.mxu1 %v2363_v47 }
 0x9c1   :  { %2229 = vmatpush3.bf16.msra.mxu1 %v2363_v47 }
 0xa43   :  { %v674_v6 = vpop.xlane.xlu0 %673 }
 0xa44   :  { %v684_v9 = vmul.f32 0.03125, %v674_v6 }
 0xa45   :  { %v677_v10 = vpop.xlane.xlu1 %676 }
 0xa46   :  { %v688_v11 = vadd.f32 1e-12, %v684_v9  ;;  %v685_v12 = vmul.f32 0.03125, %v677_v10 }
 0xa47   :  { %v680_v21 = vpop.xlane.xlu0 %679 }
 0xa48   :  { %2418 = vrsqrt.f32 %v688_v11  ;;  %v689_v22 = vadd.f32 1e-12, %v685_v12  ;;  %v686_v23 = vmul.f32 0.03125, %v680_v21 }
 0xa4a   :  { %2420 = vrsqrt.f32 %v689_v22  ;;  %v690_v24 = vadd.f32 1e-12, %v686_v23 }
 0xa4b   :  { %v683_v25 = vpop.xlane.xlu1 %682 }
 0xa4c   :  { %2422 = vrsqrt.f32 %v690_v24  ;;  %v687_v26 = vmul.f32 0.03125, %v683_v25 }
 0xa4e   :  { %v691_v27 = vadd.f32 1e-12, %v687_v26 }
 0xa50   :  { %2424 = vrsqrt.f32 %v691_v27 }
 0xa52   :  { %v2419_v28 = vpop.eup %2418 }
 0xa53   :  { %v696_v30 = vmul.f32 %v2419_v28, %v664_v52 }
 0xa54   :  { %v2421_v31 = vpop.eup %2420 }
 0xa55   :  { %v697_v32 = vmul.f32 %v2421_v31, %v665_v56  ;;  %v704_v33 = vmul.f32 %v2014_v29, %v696_v30 }
 0xa56   :  { %v2423_v34 = vpop.eup %2422 }
 0xa57   :  { %v698_v36 = vmul.f32 %v2423_v34, %v666_v58  ;;  %v705_v19 = vmul.f32 %v2014_v29, %v697_v32  ;;  %v2748_v15 = vadd.f32 %v2015_v35, %v704_v33 }
 0xa59   :  { %v2750_v37 = vadd.f32 %v2015_v35, %v705_v19  ;;  %v706_v39 = vmul.f32 %v2014_v29, %v698_v36 }
 0xa5a   :  { %v2425_v38 = vpop.eup %2424 }
 0xa5b   :  { %v699_v40 = vmul.f32 %v2425_v38, %v667_v1  ;;  %v721_v41 = vpack.c.bf16 %v2750_v37, %v2748_v15  ;;  %v2755_v43 = vadd.f32 %v2015_v35, %v706_v39  ;;  %v2021_v39 = vld [vmem:[%s3020_s2 + $0x7] ss:$0 sm:$0xff] }
 0xa5d   :  { %v707_v42 = vmul.f32 %v2014_v29, %v699_v40  ;;  %2218 = vmatprep.mubr.msk.bf16.mxu0 %vm43_vm0, %v721_v41 }
 0xa5f   :  { %v2757_v18 = vadd.f32 %v2015_v35, %v707_v42 }
 0xa61   :  { %v722_v44 = vpack.c.bf16 %v2757_v18, %v2755_v43 }
 0xa63   :  { %2219 = vmatmul.mubr.msk.bf16.vlgmr.msra.gmra.mrb[12].mxu0 %vm43_vm0, %v722_v44 }
 0xb36   :  { %v2220_v49 = vpop.f32.mrb[12].mxu0 }
 0xb37   :  { %v788_v54 = vadd.f32 %v2220_v49, %v2016_v48  ;;  %v779_v50 = vpop.f32.mrb[13].mxu0 }
 0xb38   :  { %v780_v51 = vadd.f32 %v2016_v48, %v779_v50  ;;  %v2221_v52 = vpop.f32.mrb[14].mxu0 }
 0xb39   :  { %v800_v53 = vmul.f32 0.044715, %v788_v54  ;;  %v791_v55 = vadd.f32 %v2221_v52, %v2016_v48  ;;  %v782_v56 = vpop.f32.mrb[15].mxu0  ;;  %v796_v27 = vmul.f32 0.5, %v788_v54 }
 0xb3a   :  { %v798_v59 = vmul.f32 0.044715, %v780_v51  ;;  %v783_v57 = vadd.f32 %v2016_v48, %v782_v56  ;;  %v794_v30 = vmul.f32 0.5, %v780_v51 }
 0xb3b   :  { %v804_v58 = vmul.f32 %v800_v53, %v788_v54  ;;  %v801_v61 = vmul.f32 0.044715, %v791_v55  ;;  %v797_v28 = vmul.f32 0.5, %v791_v55 }
 0xb3c   :  { %v802_v62 = vmul.f32 %v798_v59, %v780_v51  ;;  %v799_v63 = vmul.f32 0.044715, %v783_v57  ;;  %v795_v31 = vmul.f32 0.5, %v783_v57 }
 0xb3d   :  { %v808_v60 = vmul.f32 %v804_v58, %v788_v54  ;;  %v805_v0 = vmul.f32 %v801_v61, %v791_v55 }
 0xb3e   :  { %v806_v7 = vmul.f32 %v802_v62, %v780_v51  ;;  %v803_v1 = vmul.f32 %v799_v63, %v783_v57 }
 0xb3f   :  { %v812_v2 = vadd.f32 %v808_v60, %v788_v54  ;;  %v809_v8 = vmul.f32 %v805_v0, %v791_v55 }
 0xb40   :  { %v810_v3 = vadd.f32 %v806_v7, %v780_v51  ;;  %v807_v4 = vmul.f32 %v803_v1, %v783_v57 }
 0xb41   :  { %v816_v5 = vmul.f32 0.7978846, %v812_v2  ;;  %v813_v6 = vadd.f32 %v809_v8, %v791_v55 }
 0xb42   :  { %v814_v9 = vmul.f32 0.7978846, %v810_v3  ;;  %v811_v10 = vadd.f32 %v807_v4, %v783_v57 }
 0xb43   :  { %2426 = vtanh.f32 %v816_v5  ;;  %v817_v11 = vmul.f32 0.7978846, %v813_v6  ;;  %v2364_v6 = vld [vmem:[%s3019_s3 + $0x10] sm:$0xff]  }
 0xb44   :  { %2428 = vtanh.f32 %v814_v9  ;;  %v815_v12 = vmul.f32 0.7978846, %v811_v10  ;;  %2234 = vmatprep.subr.bf16.mxu0 %v2364_v6  ;;  %v2365_v9 = vld [vmem:[%s3019_s3 + $0x18] sm:$0xff]  }
 0xb45   :  { %2430 = vtanh.f32 %v817_v11  ;;  %2235 = vmatpush3.bf16.msra.mxu0 %v2364_v6 }
 0xb46   :  { %2432 = vtanh.f32 %v815_v12  ;;  %2236 = vmatprep.subr.bf16.mxu0 %v2365_v9 }
 0xb49   :  { %2237 = vmatpush3.bf16.msra.mxu0 %v2365_v9 }
 0xb4d   :  { %v2427_v21 = vpop.eup %2426 }
 0xb4e   :  { %v2429_v22 = vpop.eup %2428  ;;  %v824_v23 = vadd.f32 1.0, %v2427_v21 }
 0xb4f   :  { %v2431_v24 = vpop.eup %2430  ;;  %v822_v25 = vadd.f32 1.0, %v2429_v22 }
 0xb50   :  { %v2433_v26 = vpop.eup %2432  ;;  %v825_v29 = vadd.f32 1.0, %v2431_v24  ;;  %v828_v33 = vmul.f32 %v824_v23, %v796_v27 }
 0xb51   :  { %v823_v32 = vadd.f32 1.0, %v2433_v26  ;;  %v826_v35 = vmul.f32 %v822_v25, %v794_v30 }
 0xb52   :  { %v829_v34 = vmul.f32 %v825_v29, %v797_v28 }
 0xb53   :  { %v827_v36 = vmul.f32 %v823_v32, %v795_v31  ;;  %v2028_v31 = vld [vmem:[%s3020_s2 + $0x8] ss:$0 sm:$0xff] }
 0xb54   :  { %v840_v19 = vpack.c.bf16 %v829_v34, %v828_v33 }
 0xb55   :  { %v839_v38 = vpack.c.bf16 %v827_v36, %v826_v35 }
 0xb57   :  { %2230 = vmatprep.mubr.msk.bf16.mxu1 %vm869_vm2, %v839_v38 }
 0xb58   :  { %2231 = vmatmul.mubr.msk.bf16.vlgmr.msra.gmra.mrb[12].mxu1 %vm869_vm2, %v840_v19  ;;  %v2029_v19 = vld [vmem:[%s3020_s2 + $0x9] ss:$0 sm:$0xff] }
 0xc2b   :  { %v2232_v40 = vpop.f32.mrb[12].mxu1 }
 0xc2c   :  { %v910_v41 = vpop.f32.mrb[13].mxu1  ;;  %v919_v42 = vadd.f32 %v2232_v40, %v2021_v39 }
 0xc2d   :  { %v911_v44 = vadd.f32 %v2021_v39, %v910_v41  ;;  %v2233_v14 = vpop.f32.mrb[14].mxu1 }
 0xc2e   :  { %v913_v45 = vpop.f32.mrb[15].mxu1  ;;  %v922_v46 = vadd.f32 %v2233_v14, %v2021_v39  ;;  %v927_v50 = vadd.f32 %v919_v42, %v2755_v43 }
 0xc2f   :  { %v914_v47 = vadd.f32 %v2021_v39, %v913_v45  ;;  %v925_v48 = vadd.f32 %v911_v44, %v2748_v15 }
 0xc30   :  { %v928_v52 = vadd.f32 %v922_v46, %v2757_v18  ;;  %v937_v53 = vsel %vm43_vm0, %v927_v50, 0.0 }
 0xc31   :  { %v931_v49 = vsel %vm43_vm0, %v925_v48, 0.0  ;;  %v926_v54 = vadd.f32 %v914_v47, %v2750_v37 }
 0xc32   :  { %932 = vadd.xlane.f32.xlu0 %v931_v49  ;;  %v940_v55 = vsel %vm43_vm0, %v928_v52, 0.0 }
 0xc33   :  { %v934_v51 = vsel %vm43_vm0, %v926_v54, 0.0 }
 0xc34   :  { %935 = vadd.xlane.f32.xlu1 %v934_v51 }
 0xc36   :  { %938 = vadd.xlane.f32.xlu0 %v937_v53 }
 0xc38   :  { %941 = vadd.xlane.f32.xlu1 %v940_v55 }
 0xcbf   :  { %v933_v56 = vpop.xlane.xlu0 %932 }
 0xcc0   :  { %v943_v15 = vmul.f32 0.03125, %v933_v56 }
 0xcc1   :  { %v936_v59 = vpop.xlane.xlu1 %935 }
 0xcc2   :  { %v947_v57 = vsub.f32 %v925_v48, %v943_v15  ;;  %v944_v58 = vmul.f32 0.03125, %v936_v59 }
 0xcc3   :  { %v939_v37 = vpop.xlane.xlu0 %938 }
 0xcc4   :  { %v948_v61 = vsub.f32 %v926_v54, %v944_v58  ;;  %v945_v43 = vmul.f32 0.03125, %v939_v37  ;;  %v951_v62 = vmul.f32 %v947_v57, %v947_v57 }
 0xcc5   :  { %v942_v63 = vpop.xlane.xlu1 %941 }
 0xcc6   :  { %v949_v60 = vsub.f32 %v927_v50, %v945_v43  ;;  %v946_v0 = vmul.f32 0.03125, %v942_v63  ;;  %v955_v18 = vsel %vm43_vm0, %v951_v62, 0.0  ;;  %v952_v7 = vmul.f32 %v948_v61, %v948_v61  ;;  %v2034_v50 = vld [vmem:[%s3020_s2 + $0xa] ss:$0 sm:$0xff] }
 0xcc7   :  { %956 = vadd.xlane.f32.xlu0 %v955_v18 }
 0xcc8   :  { %v950_v1 = vsub.f32 %v928_v52, %v946_v0  ;;  %v958_v2 = vsel %vm43_vm0, %v952_v7, 0.0  ;;  %v953_v8 = vmul.f32 %v949_v60, %v949_v60 }
 0xcc9   :  { %959 = vadd.xlane.f32.xlu1 %v958_v2 }
 0xcca   :  { %v961_v3 = vsel %vm43_vm0, %v953_v8, 0.0  ;;  %v954_v4 = vmul.f32 %v950_v1, %v950_v1 }
 0xccb   :  { %962 = vadd.xlane.f32.xlu0 %v961_v3 }
 0xccc   :  { %v964_v5 = vsel %vm43_vm0, %v954_v4, 0.0 }
 0xccd   :  { %965 = vadd.xlane.f32.xlu1 %v964_v5 }
 0xd54   :  { %v957_v10 = vpop.xlane.xlu0 %956 }
 0xd55   :  { %v967_v11 = vmul.f32 0.03125, %v957_v10 }
 0xd56   :  { %v960_v12 = vpop.xlane.xlu1 %959 }
 0xd57   :  { %v971_v21 = vadd.f32 1e-12, %v967_v11  ;;  %v968_v22 = vmul.f32 0.03125, %v960_v12 }
 0xd58   :  { %v963_v23 = vpop.xlane.xlu0 %962 }
 0xd59   :  { %2434 = vrsqrt.f32 %v971_v21  ;;  %v972_v24 = vadd.f32 1e-12, %v968_v22  ;;  %v969_v25 = vmul.f32 0.03125, %v963_v23 }
 0xd5a   :  { %v966_v26 = vpop.xlane.xlu1 %965 }
 0xd5b   :  { %2436 = vrsqrt.f32 %v972_v24  ;;  %v973_v27 = vadd.f32 1e-12, %v969_v25  ;;  %v970_v28 = vmul.f32 0.03125, %v966_v26 }
 0xd5d   :  { %2438 = vrsqrt.f32 %v973_v27  ;;  %v974_v29 = vadd.f32 1e-12, %v970_v28 }
 0xd5f   :  { %2440 = vrsqrt.f32 %v974_v29 }
 0xd63   :  { %v2435_v30 = vpop.eup %2434 }
 0xd64   :  { %v979_v32 = vmul.f32 %v2435_v30, %v947_v57 }
 0xd65   :  { %v2437_v33 = vpop.eup %2436 }
 0xd66   :  { %v980_v34 = vmul.f32 %v2437_v33, %v948_v61  ;;  %v987_v35 = vmul.f32 %v2028_v31, %v979_v32 }
 0xd67   :  { %v2439_v36 = vpop.eup %2438 }
 0xd68   :  { %v981_v38 = vmul.f32 %v2439_v36, %v949_v60  ;;  %v988_v39 = vmul.f32 %v2028_v31, %v980_v34  ;;  %v2806_v44 = vadd.f32 %v2029_v19, %v987_v35 }
 0xd69   :  { %v2441_v40 = vpop.eup %2440 }
 0xd6a   :  { %v989_v41 = vmul.f32 %v2028_v31, %v981_v38  ;;  %v982_v42 = vmul.f32 %v2441_v40, %v950_v1  ;;  %v2808_v14 = vadd.f32 %v2029_v19, %v988_v39 }
 0xd6c   :  { %v990_v45 = vmul.f32 %v2028_v31, %v982_v42  ;;  %v1005_v46 = vpack.c.bf16 %v2808_v14, %v2806_v44  ;;  %v2813_v47 = vadd.f32 %v2029_v19, %v989_v41 }
 0xd6e   :  { %2238 = vmatprep.mubr.msk.bf16.mxu0 %vm43_vm0, %v1005_v46  ;;  %v2815_v48 = vadd.f32 %v2029_v19, %v990_v45 }
 0xd70   :  { %v1006_v49 = vpack.c.bf16 %v2815_v48, %v2813_v47 }
 0xd72   :  { %2239 = vmatmul.mubr.msk.bf16.vlgmr.msra.gmra.mrb[16].mxu0 %vm43_vm0, %v1006_v49 }
 0xe45   :  { %v2240_v54 = vpop.f32.mrb[16].mxu0 }
 0xe46   :  { %v1063_v51 = vpop.f32.mrb[17].mxu0  ;;  %v1072_v53 = vadd.f32 %v2240_v54, %v2034_v50 }
 0xe47   :  { %v2241_v52 = vpop.f32.mrb[18].mxu0  ;;  %v1064_v15 = vadd.f32 %v2034_v50, %v1063_v51 }
 0xe48   :  { %v1075_v55 = vadd.f32 %v2241_v52, %v2034_v50  ;;  %v1066_v56 = vpop.f32.mrb[19].mxu0 }
 0xe49   :  { %v1067_v59 = vadd.f32 %v2034_v50, %v1066_v56 }
 0xe4a   :  { %v2823_v57 = vpack.c.bf16 %v1075_v55, %v1072_v53 }
 0xe4b   :  { %v2825_v58 = vpack.c.bf16 %v1067_v59, %v1064_v15 }
 0xe4c   :  { %1084 = vrot.lane.b32.xlu1 %v2823_v57, %s2502_s26 }
 0xe4d   :  { %1082 = vrot.lane.b32.xlu0 %v2825_v58, %s2502_s26  ;;  %2246 = vmatprep.mubr.msk.bf16.mxu0 %vm199_vm1, %v2825_v58 }
 0xebe   :  { %v1085_v43 = vpop.permute.xlu1 %1084 }
 0xebf   :  { %v1083_v37 = vpop.permute.xlu0 %1082  ;;  %v1096_v62 = vsel %vm199_vm1, %v1085_v43, 0 }
 0xec0   :  { %v1093_v61 = vsel %vm199_vm1, %v1083_v37, 0  ;;  %2322 = vmatprep.subr.msk.bf16.mxu0 %vm199_vm1, %v1083_v37 }
 0xec1   :  { %2243 = vmatpush3.bf16.xpose.msra.mxu0 %v1093_v61 }
 0xec2   :  { %2323 = vmatprep.subr.msk.bf16.mxu0 %vm199_vm1, %v1085_v43 }
 0xec9   :  { %2245 = vmatpush3.bf16.xpose.msra.mxu0 %v1096_v62 }
 0xed0   :  { %2247 = vmatmul.mubr.msk.bf16.vlgmr.msra.gmra.mrb[20].mxu0 %vm199_vm1, %v2823_v57 }
 0xfa3   :  { %v2248_v63 = vpop.f32.mrb[20].mxu0 }
 0xfa4   :  { %v1132_v60 = vpop.f32.mrb[21].mxu0  ;;  %v1141_v3 = vadd.f32 %v2248_v63, %v2644_v20 }
 0xfa5   :  { %v1133_v0 = vadd.f32 %v1132_v60, %v2628_v13  ;;  %v2249_v18 = vpop.f32.mrb[22].mxu0 }
 0xfa6   :  { %v1135_v7 = vpop.f32.mrb[23].mxu0  ;;  %v1144_v1 = vadd.f32 %v2249_v18, %v2633_v16  ;;  %v1153_v6 = vsel %vm43_vm0, %v1141_v3, -inf }
 0xfa7   :  { %v1136_v2 = vadd.f32 %v1135_v7, %v2638_v17  ;;  %v1147_v8 = vsel %vm43_vm0, %v1133_v0, -inf }
 0xfa8   :  { %1148 = vmax.xlane.f32.xlu1 %v1147_v8  ;;  %v1156_v5 = vsel %vm43_vm0, %v1144_v1, -inf }
 0xfa9   :  { %v1150_v4 = vsel %vm43_vm0, %v1136_v2, -inf }
 0xfaa   :  { %1151 = vmax.xlane.f32.xlu0 %v1150_v4 }
 0xfac   :  { %1157 = vmax.xlane.f32.xlu1 %v1156_v5 }
 0xfae   :  { %1154 = vmax.xlane.f32.xlu0 %v1153_v6 }
 0xfbd   :  { %1195 = vrot.lane.b32.xlu1 %v2823_v57, %s2503_s14 }
0x1035   :  { %v1149_v13 = vpop.xlane.xlu1 %1148 }
0x1036   :  { %v1159_v10 = vsub.f32 %v1133_v0, %v1149_v13  ;;  %v2498_v0 = vld [vmem:[%s3021_s1] sm:$0xff]  ;;  %v2501_v13 = vld [vmem:[%s3021_s1 + $0x18] sm:$0xff] }
0x1037   :  { %v1152_v16 = vpop.xlane.xlu0 %1151 }
0x1038   :  { %v1160_v17 = vsub.f32 %v1136_v2, %v1152_v16  ;;  %v1163_v23 = vmul.f32 1.442695, %v1159_v10  ;;  %v2499_v2 = vld [vmem:[%s3021_s1 + $0x10] sm:$0xff] }
0x1039   :  { %v1158_v9 = vpop.xlane.xlu1 %1157 }
0x103a   :  { %v1162_v11 = vsub.f32 %v1144_v1, %v1158_v9  ;;  %v1165_v12 = vmul.f32 1.442695, %v1160_v17 }
0x103b   :  { %v1155_v20 = vpop.xlane.xlu0 %1154 }
0x103c   :  { %v1169_v21 = vmul.f32 1.442695, %v1162_v11  ;;  %v1161_v22 = vsub.f32 %v1141_v3, %v1155_v20  ;;  %v2500_v3 = vld [vmem:[%s3021_s1 + $0x8] sm:$0xff] }
0x103d   :  { %v1196_v33 = vpop.permute.xlu1 %1195 }
0x103e   :  { %2442 = vpow2.f32 %v1169_v21  ;;  %v1167_v24 = vmul.f32 1.442695, %v1161_v22 }
0x103f   :  { %2444 = vpow2.f32 %v1165_v12 }
0x1040   :  { %2446 = vpow2.f32 %v1167_v24 }
0x1041   :  { %2448 = vpow2.f32 %v1163_v23 }
0x1048   :  { %v2443_v25 = vpop.eup %2442 }
0x1049   :  { %v2445_v26 = vpop.eup %2444  ;;  %v1180_v27 = vsel %vm43_vm0, %v2443_v25, 0.0 }
0x104a   :  { %v2447_v28 = vpop.eup %2446  ;;  %1181 = vadd.xlane.f32.xlu1 %v1180_v27  ;;  %v1174_v31 = vsel %vm43_vm0, %v2445_v26, 0.0 }
0x104b   :  { %v1177_v29 = vsel %vm43_vm0, %v2447_v28, 0.0  ;;  %v2449_v30 = vpop.eup %2448 }
0x104c   :  { %1178 = vadd.xlane.f32.xlu0 %v1177_v29  ;;  %v1171_v32 = vsel %vm43_vm0, %v2449_v30, 0.0 }
0x104e   :  { %1175 = vadd.xlane.f32.xlu1 %v1174_v31 }
0x1050   :  { %1172 = vadd.xlane.f32.xlu0 %v1171_v32 }
0x105f   :  { %1258 = vrot.lane.b32.xlu1 %v2825_v58, %s2504_s15 }
0x1063   :  { %1260 = vrot.lane.b32.xlu1 %v2823_v57, %s2504_s15 }
0x1066   :  { %1193 = vrot.lane.b32.xlu0 %v2825_v58, %s2503_s14 }
0x1067   :  { %1256 = vrot.lane.b32.xlu1 %v2823_v57, %s2505_s16 }
0x106a   :  { %1254 = vrot.lane.b32.xlu0 %v2825_v58, %s2505_s16 }
0x10d7   :  { %v1182_v34 = vpop.xlane.xlu1 %1181 }
0x10d9   :  { %v1179_v35 = vpop.xlane.xlu0 %1178 }
0x10da   :  { %2450 = vrcp.f32 %v1179_v35 }
0x10db   :  { %v1176_v36 = vpop.xlane.xlu1 %1175 }
0x10dc   :  { %2452 = vrcp.f32 %v1176_v36 }
0x10dd   :  { %2454 = vrcp.f32 %v1182_v34  ;;  %v1173_v19 = vpop.xlane.xlu0 %1172 }
0x10de   :  { %2456 = vrcp.f32 %v1173_v19 }
0x10df   :  { %v1259_v42 = vpop.permute.xlu1 %1258 }
0x10e0   :  { %v1269_v55 = vsel %vm199_vm1, %v1259_v42, 0 }
0x10e1   :  { %v1194_v38 = vpop.permute.xlu0 %1193 }
0x10e2   :  { %2250 = vmatprep.subr.bf16.mxu1 %v1194_v38 }
0x10e3   :  { %2251 = vmatpush3.bf16.msra.mxu1 %v1194_v38  ;;  %v1261_v56 = vpop.permute.xlu1 %1260 }
0x10e4   :  { %2252 = vmatprep.subr.bf16.mxu1 %v1196_v33  ;;  %v2451_v39 = vpop.eup %2450  ;;  %v1272_v15 = vsel %vm199_vm1, %v1261_v56, 0 }
0x10e5   :  { %v1189_v46 = vmul.f32 %v2451_v39, %v2447_v28  ;;  %v1255_v53 = vpop.permute.xlu0 %1254 }
0x10e6   :  { %v2453_v40 = vpop.eup %2452 }
0x10e7   :  { %v2455_v41 = vpop.eup %2454  ;;  %2253 = vmatpush3.bf16.msra.mxu1 %v1196_v33  ;;  %v1188_v54 = vmul.f32 %v2453_v40, %v2445_v26  ;;  %v1257_v59 = vpop.permute.xlu1 %1256 }
0x10e8   :  { %v2457_v45 = vpop.eup %2456  ;;  %2324 = vmatprep.subr.msk.bf16.mxu1 %vm199_vm1, %v1259_v42  ;;  %v1190_v50 = vmul.f32 %v2455_v41, %v2443_v25 }
0x10e9   :  { %v1187_v49 = vmul.f32 %v2457_v45, %v2449_v30 }
0x10ea   :  { %v1192_v52 = vpack.c.bf16 %v1190_v50, %v1189_v46 }
0x10eb   :  { %v1191_v51 = vpack.c.bf16 %v1188_v54, %v1187_v49 }
0x10ed   :  { %2254 = vmatprep.mubr.msk.bf16.mxu1 %vm43_vm0, %v1191_v51 }
0x10ee   :  { %2255 = vmatmul.mubr.msk.bf16.vlgmr.msra.gmra.mrb[16].mxu1 %vm43_vm0, %v1192_v52 }
0x10ef   :  { %2262 = vmatprep.mubr.msk.bf16.mxu1 %vm199_vm1, %v1255_v53 }
0x10f0   :  { %2259 = vmatpush3.bf16.xpose.msra.mxu1 %v1269_v55  ;;  %v2366_v55 = vld [vmem:[%s3022_s4 + $0x10] sm:$0xff]  }
0x10f1   :  { %2325 = vmatprep.subr.msk.bf16.mxu1 %vm199_vm1, %v1261_v56  ;;  %v2367_v56 = vld [vmem:[%s3022_s4 + $0x18] sm:$0xff]  }
0x10f8   :  { %2261 = vmatpush3.bf16.xpose.msra.mxu1 %v1272_v15 }
0x10ff   :  { %2263 = vmatmul.mubr.msk.bf16.vlgmr.msra.gmra.mrb[20].mxu1 %vm199_vm1, %v1257_v59 }
0x11c1   :  { %v2871_v37 = vpop.f32.mrb[16].mxu1 }
0x11c2   :  { %v2873_v61 = vpop.f32.mrb[17].mxu1 }
0x11c3   :  { %v2875_v43 = vpop.f32.mrb[18].mxu1 }
0x11c4   :  { %v2877_v62 = vpop.f32.mrb[19].mxu1 }
0x11d2   :  { %v2264_v63 = vpop.f32.mrb[20].mxu1 }
0x11d3   :  { %v1308_v60 = vpop.f32.mrb[21].mxu1  ;;  %v1317_v8 = vadd.f32 %v2499_v2, %v2264_v63 }
0x11d4   :  { %v1309_v18 = vadd.f32 %v2498_v0, %v1308_v60  ;;  %v2265_v7 = vpop.f32.mrb[22].mxu1 }
0x11d5   :  { %v1311_v1 = vpop.f32.mrb[23].mxu1  ;;  %v1320_v16 = vadd.f32 %v2501_v13, %v2265_v7  ;;  %v1329_v17 = vsel %vm43_vm0, %v1317_v8, -inf }
0x11d6   :  { %v1312_v4 = vadd.f32 %v2500_v3, %v1311_v1  ;;  %v1323_v5 = vsel %vm43_vm0, %v1309_v18, -inf }
0x11d7   :  { %1324 = vmax.xlane.f32.xlu0 %v1323_v5  ;;  %v1332_v9 = vsel %vm43_vm0, %v1320_v16, -inf }
0x11d8   :  { %v1326_v6 = vsel %vm43_vm0, %v1312_v4, -inf }
0x11d9   :  { %1327 = vmax.xlane.f32.xlu1 %v1326_v6 }
0x11db   :  { %1330 = vmax.xlane.f32.xlu0 %v1329_v17 }
0x11df   :  { %1333 = vmax.xlane.f32.xlu0 %v1332_v9 }
0x1264   :  { %v1325_v10 = vpop.xlane.xlu0 %1324 }
0x1265   :  { %v1335_v11 = vsub.f32 %v1309_v18, %v1325_v10 }
0x1266   :  { %v1328_v12 = vpop.xlane.xlu1 %1327 }
0x1267   :  { %v1339_v22 = vmul.f32 1.442695, %v1335_v11  ;;  %v1336_v23 = vsub.f32 %v1312_v4, %v1328_v12 }
0x1268   :  { %v1331_v20 = vpop.xlane.xlu0 %1330 }
0x1269   :  { %v1337_v21 = vsub.f32 %v1317_v8, %v1331_v20  ;;  %v1341_v27 = vmul.f32 1.442695, %v1336_v23 }
0x126b   :  { %v1343_v24 = vmul.f32 1.442695, %v1337_v21 }
0x126c   :  { %v1334_v25 = vpop.xlane.xlu0 %1333 }
0x126d   :  { %2458 = vpow2.f32 %v1343_v24  ;;  %v1338_v26 = vsub.f32 %v1320_v16, %v1334_v25 }
0x126e   :  { %2460 = vpow2.f32 %v1339_v22 }
0x126f   :  { %v1345_v28 = vmul.f32 1.442695, %v1338_v26 }
0x1271   :  { %2462 = vpow2.f32 %v1345_v28 }
0x1272   :  { %2464 = vpow2.f32 %v1341_v27 }
0x1277   :  { %v2459_v29 = vpop.eup %2458 }
0x1278   :  { %v1353_v30 = vsel %vm43_vm0, %v2459_v29, 0.0  ;;  %v2461_v31 = vpop.eup %2460 }
0x1279   :  { %1354 = vadd.xlane.f32.xlu0 %v1353_v30  ;;  %v1347_v33 = vsel %vm43_vm0, %v2461_v31, 0.0 }
0x127b   :  { %v2463_v32 = vpop.eup %2462 }
0x127c   :  { %v1356_v34 = vsel %vm43_vm0, %v2463_v32, 0.0  ;;  %v2465_v35 = vpop.eup %2464 }
0x127d   :  { %1348 = vadd.xlane.f32.xlu0 %v1347_v33  ;;  %1357 = vadd.xlane.f32.xlu1 %v1356_v34  ;;  %v1350_v36 = vsel %vm43_vm0, %v2465_v35, 0.0 }
0x1281   :  { %1351 = vadd.xlane.f32.xlu1 %v1350_v36 }
0x1292   :  { %1371 = vrot.lane.b32.xlu1 %v2823_v57, %s2506_s0 }
0x1293   :  { %1369 = vrot.lane.b32.xlu0 %v2825_v58, %s2506_s0 }
0x1306   :  { %v1355_v19 = vpop.xlane.xlu0 %1354 }
0x130a   :  { %v1358_v38 = vpop.xlane.xlu1 %1357  ;;  %v1349_v39 = vpop.xlane.xlu0 %1348 }
0x130b   :  { %2466 = vrcp.f32 %v1358_v38 }
0x130c   :  { %2468 = vrcp.f32 %v1349_v39 }
0x130d   :  { %2470 = vrcp.f32 %v1355_v19 }
0x130e   :  { %v1352_v40 = vpop.xlane.xlu1 %1351  ;;  %v1370_v41 = vpop.permute.xlu0 %1369 }
0x130f   :  { %2472 = vrcp.f32 %v1352_v40  ;;  %2266 = vmatprep.subr.bf16.mxu0 %v1370_v41 }
0x1310   :  { %2267 = vmatpush3.bf16.msra.mxu0 %v1370_v41 }
0x1312   :  { %v1372_v42 = vpop.permute.xlu1 %1371 }
0x1313   :  { %2268 = vmatprep.subr.bf16.mxu0 %v1372_v42 }
0x1314   :  { %2269 = vmatpush3.bf16.msra.mxu0 %v1372_v42 }
0x1315   :  { %v2467_v45 = vpop.eup %2466  ;;  %2274 = vmatprep.subr.bf16.mxu0 %v2366_v55 }
0x1316   :  { %v2469_v46 = vpop.eup %2468  ;;  %v1366_v54 = vmul.f32 %v2467_v45, %v2463_v32 }
0x1317   :  { %v2471_v57 = vpop.eup %2470  ;;  %v1363_v58 = vmul.f32 %v2469_v46, %v2461_v31 }
0x1318   :  { %v1365_v51 = vmul.f32 %v2471_v57, %v2459_v29 }
0x1319   :  { %v2473_v49 = vpop.eup %2472 }
0x131a   :  { %v1364_v50 = vmul.f32 %v2473_v49, %v2465_v35  ;;  %v1368_v53 = vpack.c.bf16 %v1366_v54, %v1365_v51  ;;  %v2368_v49 = vld [vmem:[%s3023_s5 + $0x10] sm:$0xff]   ;;  %v2369_v54 = vld [vmem:[%s3023_s5 + $0x18] sm:$0xff]  }
0x131b   :  { %2282 = vmatprep.subr.bf16.mxu1 %v2368_v49 }
0x131c   :  { %v1367_v52 = vpack.c.bf16 %v1364_v50, %v1363_v58  ;;  %2283 = vmatpush3.bf16.msra.mxu1 %v2368_v49 }
0x131d   :  { %2284 = vmatprep.subr.bf16.mxu1 %v2369_v54 }
0x131e   :  { %2270 = vmatprep.mubr.msk.bf16.mxu0 %vm43_vm0, %v1367_v52 }
0x131f   :  { %2271 = vmatmul.mubr.msk.bf16.vlgmr.msra.gmra.mrb[24].mxu0 %vm43_vm0, %v1368_v53 }
0x1320   :  { %2275 = vmatpush3.bf16.msra.mxu0 %v2366_v55  ;;  %2285 = vmatpush3.bf16.msra.mxu1 %v2369_v54 }
0x1321   :  { %2276 = vmatprep.subr.bf16.mxu0 %v2367_v56 }
0x1324   :  { %2277 = vmatpush3.bf16.msra.mxu0 %v2367_v56 }
0x13f2   :  { %v2272_v15 = vpop.f32.mrb[24].mxu0 }
0x13f3   :  { %v1415_v59 = vpop.f32.mrb[25].mxu0 }
0x13f4   :  { %v2273_v63 = vpop.f32.mrb[26].mxu0 }
0x13f5   :  { %v2349_v60 = vpack.i.bf16 %v2273_v63, %v2272_v15  ;;  %v1418_v0 = vpop.f32.mrb[27].mxu0 }
0x13f6   :  { %v2344_v18 = vpack.i.bf16 %v1418_v0, %v1415_v59 }
0x13f8   :  { %2345 = vrot.lane.b32.xlu1 %v2344_v18, %s2507_s21 }
0x13fc   :  { %2350 = vrot.lane.b32.xlu1 %v2349_v60, %s2507_s21 }
0x146a   :  { %v2346_v7 = vpop.permute.xlu1 %2345 }
0x146b   :  { %v2348_v1 = vunpack.i.h.bf16 %v2346_v7  ;;  %v2347_v2 = vunpack.i.l.bf16 %v2346_v7  ;;  %v2056_v7 = vld [vmem:[%s3020_s2 + $0xc] ss:$0 sm:$0xff] }
0x146d   :  { %v1447_v8 = vsel %vm199_vm1, %v2877_v62, %v2348_v1  ;;  %v1446_v3 = vsel %vm199_vm1, %v2873_v61, %v2347_v2  ;;  %v2051_v62 = vld [vmem:[%s3020_s2 + $0xb] ss:$0 sm:$0xff] }
0x146e   :  { %v1456_v4 = vpack.c.bf16 %v1447_v8, %v1446_v3  ;;  %v2351_v5 = vpop.permute.xlu1 %2350 }
0x146f   :  { %v2353_v6 = vunpack.i.h.bf16 %v2351_v5  ;;  %v2352_v13 = vunpack.i.l.bf16 %v2351_v5  ;;  %v2057_v5 = vld [vmem:[%s3020_s2 + $0xd] ss:$0 sm:$0xff] }
0x1470   :  { %2278 = vmatprep.mubr.msk.bf16.mxu0 %vm43_vm0, %v1456_v4 }
0x1471   :  { %v1449_v16 = vsel %vm199_vm1, %v2875_v43, %v2353_v6  ;;  %v1448_v17 = vsel %vm199_vm1, %v2871_v37, %v2352_v13 }
0x1472   :  { %v1457_v9 = vpack.c.bf16 %v1449_v16, %v1448_v17 }
0x1474   :  { %2279 = vmatmul.mubr.msk.bf16.vlgmr.msra.gmra.mrb[28].mxu0 %vm43_vm0, %v1457_v9 }
0x1547   :  { %v2280_v61 = vpop.f32.mrb[28].mxu0 }
0x1548   :  { %v1514_v10 = vpop.f32.mrb[29].mxu0  ;;  %v1523_v11 = vadd.f32 %v2280_v61, %v2051_v62 }
0x1549   :  { %v1515_v12 = vadd.f32 %v2051_v62, %v1514_v10  ;;  %v2281_v20 = vpop.f32.mrb[30].mxu0 }
0x154a   :  { %v1517_v21 = vpop.f32.mrb[31].mxu0  ;;  %v1526_v43 = vadd.f32 %v2281_v20, %v2051_v62  ;;  %v1531_v25 = vadd.f32 %v1523_v11, %v2813_v47 }
0x154b   :  { %v1518_v22 = vadd.f32 %v2051_v62, %v1517_v21  ;;  %v1529_v23 = vadd.f32 %v1515_v12, %v2806_v44 }
0x154c   :  { %v1541_v27 = vsel %vm43_vm0, %v1531_v25, 0.0  ;;  %v1532_v28 = vadd.f32 %v1526_v43, %v2815_v48  ;;  %v2372_v43 = vld [vmem:[%s3024_s6 + $0x30] sm:$0xff]  }
0x154d   :  { %v1535_v24 = vsel %vm43_vm0, %v1529_v23, 0.0  ;;  %v1530_v37 = vadd.f32 %v1518_v22, %v2808_v14  ;;  %v2370_v22 = vld [vmem:[%s3024_s6 + $0x20] sm:$0xff]  }
0x154e   :  { %1536 = vadd.xlane.f32.xlu0 %v1535_v24  ;;  %v1544_v29 = vsel %vm43_vm0, %v1532_v28, 0.0  ;;  %2290 = vmatprep.subr.bf16.mxu0 %v2370_v22  ;;  %v2373_v24 = vld [vmem:[%s3024_s6 + $0x38] sm:$0xff]  }
0x154f   :  { %v1538_v26 = vsel %vm43_vm0, %v1530_v37, 0.0  ;;  %2291 = vmatpush3.bf16.msra.mxu0 %v2370_v22 }
0x1550   :  { %1539 = vadd.xlane.f32.xlu1 %v1538_v26 }
0x1552   :  { %1542 = vadd.xlane.f32.xlu0 %v1541_v27 }
0x1556   :  { %1545 = vadd.xlane.f32.xlu0 %v1544_v29 }
0x15db   :  { %v1537_v44 = vpop.xlane.xlu0 %1536 }
0x15dc   :  { %v1547_v30 = vmul.f32 0.03125, %v1537_v44 }
0x15dd   :  { %v1540_v31 = vpop.xlane.xlu1 %1539 }
0x15de   :  { %v1551_v32 = vsub.f32 %v1529_v23, %v1547_v30  ;;  %v1548_v33 = vmul.f32 0.03125, %v1540_v31  ;;  %v2371_v23 = vld [vmem:[%s3024_s6 + $0x28] sm:$0xff]  }
0x15df   :  { %v1543_v14 = vpop.xlane.xlu0 %1542  ;;  %2292 = vmatprep.subr.bf16.mxu0 %v2371_v23 }
0x15e0   :  { %v1552_v34 = vsub.f32 %v1530_v37, %v1548_v33  ;;  %v1549_v47 = vmul.f32 0.03125, %v1543_v14  ;;  %v1555_v35 = vmul.f32 %v1551_v32, %v1551_v32  ;;  %2293 = vmatpush3.bf16.msra.mxu0 %v2371_v23  ;;  %v2062_v37 = vld [vmem:[%s3020_s2 + $0xe] ss:$0 sm:$0xff] }
0x15e1   :  { %2294 = vmatprep.subr.bf16.mxu0 %v2372_v43 }
0x15e2   :  { %v1553_v36 = vsub.f32 %v1531_v25, %v1549_v47  ;;  %v1559_v19 = vsel %vm43_vm0, %v1555_v35, 0.0  ;;  %v1556_v38 = vmul.f32 %v1552_v34, %v1552_v34 }
0x15e3   :  { %1560 = vadd.xlane.f32.xlu0 %v1559_v19  ;;  %v1546_v39 = vpop.xlane.xlu0 %1545 }
0x15e4   :  { %v1550_v48 = vmul.f32 0.03125, %v1546_v39  ;;  %v1562_v40 = vsel %vm43_vm0, %v1556_v38, 0.0  ;;  %v1557_v41 = vmul.f32 %v1553_v36, %v1553_v36  ;;  %2295 = vmatpush3.bf16.msra.mxu0 %v2372_v43 }
0x15e5   :  { %1563 = vadd.xlane.f32.xlu1 %v1562_v40  ;;  %2296 = vmatprep.subr.bf16.mxu0 %v2373_v24 }
0x15e6   :  { %v1554_v42 = vsub.f32 %v1532_v28, %v1550_v48  ;;  %v1565_v45 = vsel %vm43_vm0, %v1557_v41, 0.0 }
0x15e7   :  { %1566 = vadd.xlane.f32.xlu0 %v1565_v45 }
0x15e8   :  { %v1558_v46 = vmul.f32 %v1554_v42, %v1554_v42  ;;  %2297 = vmatpush3.bf16.msra.mxu0 %v2373_v24 }
0x15ea   :  { %v1568_v57 = vsel %vm43_vm0, %v1558_v46, 0.0 }
0x15eb   :  { %1569 = vadd.xlane.f32.xlu1 %v1568_v57 }
0x1670   :  { %v1561_v58 = vpop.xlane.xlu0 %1560 }
0x1671   :  { %v1571_v50 = vmul.f32 0.03125, %v1561_v58 }
0x1672   :  { %v1564_v51 = vpop.xlane.xlu1 %1563 }
0x1673   :  { %v1575_v52 = vadd.f32 1e-12, %v1571_v50  ;;  %v1572_v53 = vmul.f32 0.03125, %v1564_v51 }
0x1674   :  { %v1567_v55 = vpop.xlane.xlu0 %1566 }
0x1675   :  { %2474 = vrsqrt.f32 %v1575_v52  ;;  %v1576_v56 = vadd.f32 1e-12, %v1572_v53  ;;  %v1573_v15 = vmul.f32 0.03125, %v1567_v55 }
0x1677   :  { %2476 = vrsqrt.f32 %v1576_v56  ;;  %v1577_v59 = vadd.f32 1e-12, %v1573_v15 }
0x1678   :  { %v1570_v63 = vpop.xlane.xlu1 %1569 }
0x1679   :  { %2478 = vrsqrt.f32 %v1577_v59  ;;  %v1574_v60 = vmul.f32 0.03125, %v1570_v63 }
0x167b   :  { %v1578_v0 = vadd.f32 1e-12, %v1574_v60 }
0x167d   :  { %2480 = vrsqrt.f32 %v1578_v0 }
0x167f   :  { %v2475_v18 = vpop.eup %2474 }
0x1680   :  { %v1583_v1 = vmul.f32 %v2475_v18, %v1551_v32 }
0x1681   :  { %v2477_v2 = vpop.eup %2476 }
0x1682   :  { %v1584_v8 = vmul.f32 %v2477_v2, %v1552_v34  ;;  %v1591_v3 = vmul.f32 %v2056_v7, %v1583_v1 }
0x1683   :  { %v2479_v4 = vpop.eup %2478 }
0x1684   :  { %v1585_v6 = vmul.f32 %v2479_v4, %v1553_v36  ;;  %v1592_v13 = vmul.f32 %v2056_v7, %v1584_v8  ;;  %v2950_v16 = vadd.f32 %v2057_v5, %v1591_v3 }
0x1686   :  { %v1600_v17 = vadd.f32 %v2057_v5, %v1592_v13  ;;  %v1593_v62 = vmul.f32 %v2056_v7, %v1585_v6 }
0x1687   :  { %v2481_v9 = vpop.eup %2480 }
0x1688   :  { %v1586_v61 = vmul.f32 %v2481_v9, %v1554_v42  ;;  %v1609_v10 = vpack.c.bf16 %v1600_v17, %v2950_v16  ;;  %v2954_v12 = vadd.f32 %v2057_v5, %v1593_v62 }
0x168a   :  { %v1594_v11 = vmul.f32 %v2056_v7, %v1586_v61  ;;  %2286 = vmatprep.mubr.msk.bf16.mxu1 %vm43_vm0, %v1609_v10 }
0x168c   :  { %v1602_v20 = vadd.f32 %v2057_v5, %v1594_v11  ;;  %v2075_v5 = vld [vmem:[%s3020_s2 + $0xf] ss:$0 sm:$0xff] }
0x168e   :  { %v1610_v21 = vpack.c.bf16 %v1602_v20, %v2954_v12 }
0x1690   :  { %2287 = vmatmul.mubr.msk.bf16.vlgmr.msra.gmra.mrb[24].mxu1 %vm43_vm0, %v1610_v21 }
0x1763   :  { %v2288_v25 = vpop.f32.mrb[24].mxu1 }
0x1764   :  { %v1676_v26 = vadd.f32 %v2288_v25, %v2062_v37  ;;  %v1667_v27 = vpop.f32.mrb[25].mxu1 }
0x1765   :  { %v1668_v28 = vadd.f32 %v2062_v37, %v1667_v27  ;;  %v2289_v29 = vpop.f32.mrb[26].mxu1 }
0x1766   :  { %v1688_v44 = vmul.f32 0.044715, %v1676_v26  ;;  %v1679_v30 = vadd.f32 %v2289_v29, %v2062_v37  ;;  %v1670_v31 = vpop.f32.mrb[27].mxu1  ;;  %v1684_v15 = vmul.f32 0.5, %v1676_v26  ;;  %v2508_v29 = vmov 0.0  }
0x1767   :  { %v1686_v32 = vmul.f32 0.044715, %v1668_v28  ;;  %v1671_v33 = vadd.f32 %v2062_v37, %v1670_v31  ;;  %v1682_v60 = vmul.f32 0.5, %v1668_v28  ;;  %2302 = vmatprep.subr.bf16.mxu1 %v2508_v29  ;;  %2306 = vmatprep.mubr.msk.bf16.mxu1 %vm2509_vm3, %v2508_v29 }
0x1768   :  { %v1692_v14 = vmul.f32 %v1688_v44, %v1676_v26  ;;  %v1689_v34 = vmul.f32 0.044715, %v1679_v30  ;;  %v1685_v59 = vmul.f32 0.5, %v1679_v30  ;;  %v2375_v44 = vld [vmem:[%s3025_s7 + $0x8] sm:$0xff]  }
0x1769   :  { %v1690_v47 = vmul.f32 %v1686_v32, %v1668_v28  ;;  %v1687_v35 = vmul.f32 0.044715, %v1671_v33  ;;  %v1683_v0 = vmul.f32 0.5, %v1671_v33 }
0x176a   :  { %v1696_v36 = vmul.f32 %v1692_v14, %v1676_v26  ;;  %v1693_v19 = vmul.f32 %v1689_v34, %v1679_v30 }
0x176b   :  { %v1694_v38 = vmul.f32 %v1690_v47, %v1668_v28  ;;  %v1691_v39 = vmul.f32 %v1687_v35, %v1671_v33  ;;  %v2082_v35 = vld [vmem:[%s3020_s2 + $0x10] ss:$0 sm:$0xff] }
0x176c   :  { %v1700_v48 = vadd.f32 %v1696_v36, %v1676_v26  ;;  %v1697_v40 = vmul.f32 %v1693_v19, %v1679_v30 }
0x176d   :  { %v1698_v41 = vadd.f32 %v1694_v38, %v1668_v28  ;;  %v1695_v42 = vmul.f32 %v1691_v39, %v1671_v33  ;;  %v2083_v39 = vld [vmem:[%s3020_s2 + $0x11] ss:$0 sm:$0xff] }
0x176e   :  { %v1704_v45 = vmul.f32 0.7978846, %v1700_v48  ;;  %v1701_v46 = vadd.f32 %v1697_v40, %v1679_v30 }
0x176f   :  { %v1702_v57 = vmul.f32 0.7978846, %v1698_v41  ;;  %v1699_v49 = vadd.f32 %v1695_v42, %v1671_v33 }
0x1770   :  { %2482 = vtanh.f32 %v1704_v45  ;;  %v1705_v54 = vmul.f32 0.7978846, %v1701_v46  ;;  %v2376_v46 = vld [vmem:[%s3026_s8] sm:$0xff]  }
0x1771   :  { %2484 = vtanh.f32 %v1702_v57  ;;  %v1703_v58 = vmul.f32 0.7978846, %v1699_v49  ;;  %v2377_v57 = vld [vmem:[%s3026_s8 + $0x8] sm:$0xff]   ;;  %v2084_v49 = vld [vmem:[%s3020_s2 + $0x12] ss:$0 sm:$0xff] }
0x1772   :  { %2486 = vtanh.f32 %v1705_v54 }
0x1773   :  { %2488 = vtanh.f32 %v1703_v58 }
0x177a   :  { %v2483_v50 = vpop.eup %2482 }
0x177b   :  { %v2485_v51 = vpop.eup %2484  ;;  %v1712_v52 = vadd.f32 1.0, %v2483_v50 }
0x177c   :  { %v2487_v53 = vpop.eup %2486  ;;  %v1710_v55 = vadd.f32 1.0, %v2485_v51 }
0x177d   :  { %v2489_v56 = vpop.eup %2488  ;;  %v1713_v63 = vadd.f32 1.0, %v2487_v53  ;;  %v1716_v7 = vmul.f32 %v1712_v52, %v1684_v15 }
0x177e   :  { %v1711_v18 = vadd.f32 1.0, %v2489_v56  ;;  %v1714_v2 = vmul.f32 %v1710_v55, %v1682_v60 }
0x177f   :  { %v1717_v1 = vmul.f32 %v1713_v63, %v1685_v59  ;;  %v2088_v59 = vld [vmem:[%s3020_s2 + $0x13] ss:$0 sm:$0xff] }
0x1780   :  { %v1715_v8 = vmul.f32 %v1711_v18, %v1683_v0 }
0x1781   :  { %v1729_v3 = vpack.c.bf16 %v1717_v1, %v1716_v7 }
0x1782   :  { %v1728_v4 = vpack.c.bf16 %v1715_v8, %v1714_v2 }
0x1784   :  { %2298 = vmatprep.mubr.msk.bf16.mxu0 %vm869_vm2, %v1728_v4 }
0x1785   :  { %2299 = vmatmul.mubr.msk.bf16.vlgmr.msra.gmra.mrb[32].mxu0 %vm869_vm2, %v1729_v3 }
0x1858   :  { %v2300_v6 = vpop.f32.mrb[32].mxu0 }
0x1859   :  { %v1806_v13 = vadd.f32 %v2300_v6, %v2075_v5  ;;  %v1798_v17 = vpop.f32.mrb[33].mxu0 }
0x185a   :  { %v1799_v9 = vadd.f32 %v2075_v5, %v1798_v17  ;;  %v2301_v62 = vpop.f32.mrb[34].mxu0 }
0x185b   :  { %v1801_v61 = vpop.f32.mrb[35].mxu0  ;;  %v1812_v10 = vadd.f32 %v1806_v13, %v2954_v12 }
0x185c   :  { %v1811_v11 = vadd.f32 %v1799_v9, %v2950_v16  ;;  %v2374_v16 = vld [vmem:[%s3025_s7] sm:$0xff]  }
0x185d   :  { %v1818_v20 = vsel %vm43_vm0, %v1812_v10, 0.0  ;;  %2303 = vmatpush3.bf16.msra.mxu1 %v2374_v16 }
0x185e   :  { %1819 = vadd.xlane.f32.xlu1 %v1818_v20  ;;  %v1815_v21 = vsel %vm43_vm0, %v1811_v11, 0.0  ;;  %2304 = vmatprep.subr.bf16.mxu1 %v2508_v29 }
0x185f   :  { %1816 = vadd.xlane.f32.xlu0 %v1815_v21 }
0x1861   :  { %2305 = vmatpush3.bf16.msra.mxu1 %v2375_v44 }
0x1862   :  { %2310 = vmatprep.subr.bf16.mxu1 %v2508_v29 }
0x18eb   :  { %v1820_v22 = vpop.xlane.xlu1 %1819 }
0x18ec   :  { %v1822_v23 = vmul.f32 0.03125, %v1820_v22  ;;  %v1817_v43 = vpop.xlane.xlu0 %1816 }
0x18ed   :  { %v1821_v24 = vmul.f32 0.03125, %v1817_v43 }
0x18ee   :  { %v1824_v37 = vsub.f32 %v1812_v10, %v1822_v23 }
0x18ef   :  { %v1823_v25 = vsub.f32 %v1811_v11, %v1821_v24 }
0x18f0   :  { %v1826_v26 = vmul.f32 %v1824_v37, %v1824_v37 }
0x18f1   :  { %v1825_v27 = vmul.f32 %v1823_v25, %v1823_v25 }
0x18f2   :  { %v1830_v28 = vsel %vm43_vm0, %v1826_v26, 0.0 }
0x18f3   :  { %1831 = vadd.xlane.f32.xlu1 %v1830_v28  ;;  %v1827_v12 = vsel %vm43_vm0, %v1825_v27, 0.0 }
0x18f4   :  { %1828 = vadd.xlane.f32.xlu0 %v1827_v12 }
0x1980   :  { %v1832_v30 = vpop.xlane.xlu1 %1831 }
0x1981   :  { %v1834_v31 = vmul.f32 0.03125, %v1832_v30  ;;  %v1829_v32 = vpop.xlane.xlu0 %1828 }
0x1982   :  { %v1833_v33 = vmul.f32 0.03125, %v1829_v32 }
0x1983   :  { %v1836_v14 = vadd.f32 1e-12, %v1834_v31 }
0x1984   :  { %v1835_v34 = vadd.f32 1e-12, %v1833_v33 }
0x1985   :  { %2490 = vrsqrt.f32 %v1836_v14 }
0x1986   :  { %2492 = vrsqrt.f32 %v1835_v34 }
0x198f   :  { %v2491_v47 = vpop.eup %2490 }
0x1990   :  { %v2493_v36 = vpop.eup %2492  ;;  %v1840_v19 = vmul.f32 %v2491_v47, %v1824_v37 }
0x1991   :  { %v1839_v38 = vmul.f32 %v2493_v36, %v1823_v25 }
0x1992   :  { %v1846_v48 = vmul.f32 %v2082_v35, %v1840_v19 }
0x1993   :  { %v1845_v40 = vmul.f32 %v2082_v35, %v1839_v38 }
0x1994   :  { %v1852_v41 = vadd.f32 %v2083_v39, %v1846_v48 }
0x1995   :  { %v1851_v42 = vadd.f32 %v2083_v39, %v1845_v40 }
0x1997   :  { %v1858_v45 = vpack.c.bf16 %v1852_v41, %v1851_v42 }
0x1999   :  { %2307 = vmatmul.mubr.msk.bf16.vlgmr.msra.gmra.mrb[28].mxu1 %vm43_vm0, %v1858_v45 }
0x199a   :  { %2314 = vmatprep.mubr.msk.bf16.mxu1 %vm2509_vm3, %v2508_v29  ;;  %2311 = vmatpush3.bf16.msra.mxu1 %v2376_v46 }
0x199b   :  { %2312 = vmatprep.subr.bf16.mxu1 %v2508_v29 }
0x199e   :  { %2313 = vmatpush3.bf16.msra.mxu1 %v2377_v57 }
0x1a6c   :  { %v1912_v54 = vpop.f32.mrb[28].mxu1 }
0x1a6d   :  { %v1913_v58 = vadd.f32 %v2084_v49, %v1912_v54  ;;  %v2308_v50 = vpop.f32.mrb[29].mxu1 }
0x1a6e   :  { %v1915_v51 = vpop.f32.mrb[30].mxu1 }
0x1a6f   :  { %v1916_v52 = vadd.f32 %v2084_v49, %v1915_v51  ;;  %v2309_v53 = vpop.f32.mrb[31].mxu1  ;;  %2494 = vtanh.f32 %v1913_v58 }
0x1a71   :  { %2496 = vtanh.f32 %v1916_v52 }
0x1a79   :  { %v2495_v55 = vpop.eup %2494 }
0x1a7b   :  { %v2497_v56 = vpop.eup %2496 }
0x1a7c   :  { %v1926_v15 = vpack.c.bf16 %v2497_v56, %v2495_v55 }
0x1a7e   :  { %2315 = vmatmul.mubr.msk.bf16.vlgmr.msra.gmra.mrb[32].mxu1 %vm43_vm0, %v1926_v15 }
0x1b51   :  { %v1980_v63 = vpop.f32.mrb[32].mxu1 }
0x1b52   :  { %v1981_v60 = vadd.f32 %v2088_v59, %v1980_v63  ;;  %v2316_v0 = vpop.f32.mrb[33].mxu1 }
0x1b53   :  { %v1983_v18 = vpop.f32.mrb[34].mxu1 }
0x1b54   :  { %1988 = vst.msk [vmem:[%s3027_s9] sm:$0xff] %vm1987_vm4, %v1981_v60  ;;  %v1984_v7 = vadd.f32 %v2088_v59, %v1983_v18  ;;  %v2317_v1 = vpop.f32.mrb[35].mxu1 }
0x1b56   :  { %1989 = vst.msk [vmem:[%s3027_s9 + $0x8] sm:$0xff] %vm1987_vm4, %v1984_v7 }

</bundles_post_ra>
